<compile_context>
chip_gen: v6e
topology: v6e:2x2x1
jax: 0.10.0
libtpu: 0.0.40
codegen_flags: <defaults>
</compile_context>

<pallas_src>
import jax
import jax.numpy as jnp
from jax import lax
from jax.experimental import pallas as pl
from jax.experimental.pallas import tpu as pltpu

IN_FEATURES = 128
HIDDEN = 256
SUBLANES = 8          # f32 sublane granularity; layer-3 rows padded to this
DEFAULT_BATCH_TILE = 512


def _cdiv(a, b):
    return -(-a // b)


def _round_up(a, b):
    return _cdiv(a, b) * b


def _leaky_relu(x, slope=0.2):
    return jnp.where(x >= 0, x, slope * x)


def disc_kernel(x_ref, w1_ref, b1_ref, w2_ref, b2_ref, w3t_ref, b3_ref, o_ref):
    """Fused 3-layer MLP on one [TB, F] batch tile."""
    x = x_ref[...].astype(jnp.bfloat16)                                # [TB, F]

    h1 = jnp.dot(x, w1_ref[...], preferred_element_type=jnp.float32)  # [TB, H]
    h1 = _leaky_relu(h1 + b1_ref[...])

    h2 = jnp.dot(h1.astype(jnp.bfloat16), w2_ref[...],
                 preferred_element_type=jnp.float32)                   # [TB, H]
    h2 = _leaky_relu(h2 + b2_ref[...])

    # Layer 3, transposed: [8, H] . [TB, H]^T -> [8, TB].  Row 0 is the real
    # logit row (rows 1..7 are zero padding for sublane alignment); the batch
    # now lives on the lane axis -> lane-dense, unmasked output stores.
    h3 = lax.dot_general(
        w3t_ref[...], h2.astype(jnp.bfloat16),
        dimension_numbers=(((1,), (1,)), ((), ())),
        preferred_element_type=jnp.float32)                            # [8, TB]
    h3 = h3 + b3_ref[0]

    # Clamp so exp(-h3) stays finite for strongly negative logits
    # (sigmoid(-30) ~ 1e-13; indistinguishable from exact in f32).
    h3 = jnp.maximum(h3, -30.0)
    # sigmoid(z) = 1 / (1 + exp(-z)); approx reciprocal rides the EUP slot.
    o_ref[...] = pl.reciprocal(1.0 + jnp.exp(-h3), approx=True)


def prepare_params(params):
    """One-time weight prep (call at init / param-update time and CACHE it).

    Casts the matmul weights to bf16 for the MXU and lays layer 3 out
    transposed and zero-padded to [8, H] (row 0 real) so the kernel can emit
    a lane-dense logit row.  Do NOT call this per forward pass.
    """
    w1, b1, w2, b2, w3, b3 = params
    F, H = w1.shape
    assert w2.shape == (H, H) and w3.shape == (H, 1)
    w1_b = w1.astype(jnp.bfloat16)                                  # [F, H]
    w2_b = w2.astype(jnp.bfloat16)                                  # [H, H]
    w3t_b = jnp.zeros((SUBLANES, H), jnp.bfloat16).at[0, :].set(
        w3[:, 0].astype(jnp.bfloat16))                              # [8, H]
    b1_f = b1.reshape(1, H).astype(jnp.float32)
    b2_f = b2.reshape(1, H).astype(jnp.float32)
    b3_s = b3.reshape(1).astype(jnp.float32)                        # SMEM scalar
    return (w1_b, b1_f, w2_b, b2_f, w3t_b, b3_s)


def discriminator_forward(x, prepared, *, batch_tile=DEFAULT_BATCH_TILE,
                          min_tiles=1):
    """Fused discriminator forward.

    `prepared` must come from prepare_params() (cached across calls).
    `batch_tile` rows are processed per grid step; it is clamped so small
    batches run as a single step (best on single-TC v5e/v6e).  On v7x pass
    min_tiles=2 so the "parallel" grid axis keeps both TensorCores busy.
    """
    w1_b, b1_f, w2_b, b2_f, w3t_b, b3_s = prepared
    B, F = x.shape
    H = w1_b.shape[1]
    assert w1_b.shape == (F, H)

    # Tile selection: multiple of 128 (lane-dense output, f32 sublanes),
    # no larger than the padded batch, shrunk when min_tiles > 1.
    bt = _round_up(min(int(batch_tile), _round_up(B, 128)), 128)
    bt = min(bt, max(128, _round_up(_cdiv(B, max(1, int(min_tiles))), 128)))
    n_tiles = _cdiv(B, bt)
    Bp = n_tiles * bt
    if Bp != B:
        # Padded batch rows produce junk sigmoid values; they are sliced off
        # below -- never consume the padded kernel output directly.
        x = jnp.pad(x, ((0, Bp - B), (0, 0)))

    flops = 2 * Bp * (F * H + H * H + H * SUBLANES)
    bytes_accessed = (Bp * F * 4                                   # x (f32 in)
                      + (F * H + H * H + SUBLANES * H) * 2         # bf16 weights
                      + (2 * H + 1) * 4                            # biases
                      + SUBLANES * Bp * 4)                         # logit rows
    cost = pl.CostEstimate(flops=flops, transcendentals=SUBLANES * Bp,
                           bytes_accessed=bytes_accessed)

    out = pl.pallas_call(
        disc_kernel,
        out_shape=jax.ShapeDtypeStruct((SUBLANES, Bp), jnp.float32),
        grid_spec=pltpu.PrefetchScalarGridSpec(
            num_scalar_prefetch=0,
            grid=(n_tiles,),
            in_specs=[
                pl.BlockSpec((bt, F), lambda i: (i, 0)),            # x tile
                pl.BlockSpec((F, H), lambda i: (0, 0)),             # w1 (bf16)
                pl.BlockSpec((1, H), lambda i: (0, 0)),             # b1 (f32)
                pl.BlockSpec((H, H), lambda i: (0, 0)),             # w2 (bf16)
                pl.BlockSpec((1, H), lambda i: (0, 0)),             # b2 (f32)
                pl.BlockSpec((SUBLANES, H), lambda i: (0, 0)),      # w3^T pad
                pl.BlockSpec(memory_space=pltpu.MemorySpace.SMEM),  # b3 scalar
            ],
            out_specs=pl.BlockSpec((SUBLANES, bt), lambda i: (0, i)),
        ),
        compiler_params=pltpu.CompilerParams(
            dimension_semantics=("parallel",)),
        cost_estimate=cost,
    )(x, w1_b, b1_f, w2_b, b2_f, w3t_b, b3_s)

    # Row 0 holds the real logits; rows 1..7 and batch-pad columns are junk.
    return out[0, :B].reshape(B, 1)


def init_params(key, in_features=IN_FEATURES, hidden=HIDDEN):
    # Deterministic init mimicking nn.Linear (uniform in +/- 1/sqrt(fan_in)).
    ks = jax.random.split(key, 6)

    def lin(kw, kb, fan_in, fan_out):
        bound = 1.0 / jnp.sqrt(fan_in)
        w = jax.random.uniform(kw, (fan_in, fan_out), jnp.float32, -bound, bound)
        b = jax.random.uniform(kb, (1, fan_out), jnp.float32, -bound, bound)
        return w, b

    w1, b1 = lin(ks[0], ks[1], in_features, hidden)
    w2, b2 = lin(ks[2], ks[3], hidden, hidden)
    w3, b3 = lin(ks[4], ks[5], hidden, 1)
    return (w1, b1, w2, b2, w3, b3)


def reference_forward(x, params):
    # Pure f32 reference (matches the PyTorch module's math).
    w1, b1, w2, b2, w3, b3 = params
    h = x @ w1 + b1
    h = jnp.where(h >= 0, h, 0.2 * h)
    h = h @ w2 + b2
    h = jnp.where(h >= 0, h, 0.2 * h)
    return jax.nn.sigmoid(h @ w3 + b3)


if __name__ == "__main__":
    key = jax.random.PRNGKey(0)
    k_x, k_p = jax.random.split(key)

    B = 512
    x = jax.random.normal(k_x, (B, IN_FEATURES), jnp.float32)
    params = init_params(k_p)

    # Weight prep is hoisted out of the forward: done once, reused each call.
    prepared = prepare_params(params)

    fwd = jax.jit(discriminator_forward)
    out = jax.block_until_ready(fwd(x, prepared))

    ref = reference_forward(x, params)
    assert out.shape == (B, 1)
    # bf16 MXU inputs + approx reciprocal -> loosened tolerance vs f32 ref.
    assert jnp.allclose(out, ref, atol=2e-2, rtol=2e-2), float(
        jnp.max(jnp.abs(out - ref)))

    print("KERNEL_OK")
</pallas_src>

<mosaic_0001>
module attributes {stable_mosaic.version = 11 : i64} {
  func.func @disc_kernel(%arg0: i32, %arg1: memref<512x128xf32, #tpu.memory_space<vmem>>, %arg2: memref<128x256xbf16, #tpu.memory_space<vmem>>, %arg3: memref<1x256xf32, #tpu.memory_space<vmem>>, %arg4: memref<256x256xbf16, #tpu.memory_space<vmem>>, %arg5: memref<1x256xf32, #tpu.memory_space<vmem>>, %arg6: memref<8x256xbf16, #tpu.memory_space<vmem>>, %arg7: memref<1xf32, #tpu.memory_space<smem>>, %arg8: memref<8x512xf32, #tpu.memory_space<vmem>>) attributes {dimension_semantics = [#tpu.dimension_semantics<parallel>], iteration_bounds = array<i64: 1>, scalar_prefetch = 0 : i64, scratch_operands = 0 : i64, tpu.core_type = #tpu.core_type<tc>, window_params = [{transform_indices = @transform_0, window_bounds = array<i64: 512, 128>}, {pipeline_mode = #tpu.pipeline_mode<synchronous>, transform_indices = @transform_1, window_bounds = array<i64: 128, 256>}, {pipeline_mode = #tpu.pipeline_mode<synchronous>, transform_indices = @transform_2, window_bounds = array<i64: 1, 256>}, {pipeline_mode = #tpu.pipeline_mode<synchronous>, transform_indices = @transform_3, window_bounds = array<i64: 256, 256>}, {pipeline_mode = #tpu.pipeline_mode<synchronous>, transform_indices = @transform_4, window_bounds = array<i64: 1, 256>}, {pipeline_mode = #tpu.pipeline_mode<synchronous>, transform_indices = @transform_5, window_bounds = array<i64: 8, 256>}, {transform_indices = @transform_6, window_bounds = array<i64: 1>}, {transform_indices = @transform_7, window_bounds = array<i64: 8, 512>}]} {
    %c0 = arith.constant 0 : index
    %c0_0 = arith.constant 0 : index
    %0 = vector.load %arg1[%c0, %c0_0] : memref<512x128xf32, #tpu.memory_space<vmem>>, vector<512x128xf32>
    %1 = arith.truncf %0 : vector<512x128xf32> to vector<512x128xbf16>
    %c0_1 = arith.constant 0 : index
    %c0_2 = arith.constant 0 : index
    %2 = vector.load %arg2[%c0_1, %c0_2] : memref<128x256xbf16, #tpu.memory_space<vmem>>, vector<128x256xbf16>
    %cst = arith.constant dense<0.000000e+00> : vector<512x256xf32>
    %3 = tpu.matmul %1, %2, %cst {dimension_numbers = #tpu.dot_dimension_numbers<[1], [0], [0], [1], [0, 0, 1, 1], [], []>} : vector<512x128xbf16>, vector<128x256xbf16>, vector<512x256xf32> -> vector<512x256xf32>
    %c0_3 = arith.constant 0 : index
    %c0_4 = arith.constant 0 : index
    %4 = vector.load %arg3[%c0_3, %c0_4] : memref<1x256xf32, #tpu.memory_space<vmem>>, vector<1x256xf32>
    %5 = vector.broadcast %4 : vector<1x256xf32> to vector<512x256xf32>
    %6 = arith.addf %3, %5 : vector<512x256xf32>
    %cst_5 = arith.constant 0.000000e+00 : f32
    %7 = vector.broadcast %cst_5 : f32 to vector<512x256xf32>
    %8 = arith.cmpf oge, %6, %7 : vector<512x256xf32>
    %cst_6 = arith.constant 2.000000e-01 : f32
    %9 = vector.broadcast %cst_6 : f32 to vector<512x256xf32>
    %10 = arith.mulf %9, %6 : vector<512x256xf32>
    %11 = arith.select %8, %6, %10 : vector<512x256xi1>, vector<512x256xf32>
    %12 = arith.truncf %11 : vector<512x256xf32> to vector<512x256xbf16>
    %c0_7 = arith.constant 0 : index
    %c0_8 = arith.constant 0 : index
    %13 = vector.load %arg4[%c0_7, %c0_8] : memref<256x256xbf16, #tpu.memory_space<vmem>>, vector<256x256xbf16>
    %cst_9 = arith.constant dense<0.000000e+00> : vector<512x256xf32>
    %14 = tpu.matmul %12, %13, %cst_9 {dimension_numbers = #tpu.dot_dimension_numbers<[1], [0], [0], [1], [0, 0, 1, 1], [], []>} : vector<512x256xbf16>, vector<256x256xbf16>, vector<512x256xf32> -> vector<512x256xf32>
    %c0_10 = arith.constant 0 : index
    %c0_11 = arith.constant 0 : index
    %15 = vector.load %arg5[%c0_10, %c0_11] : memref<1x256xf32, #tpu.memory_space<vmem>>, vector<1x256xf32>
    %16 = vector.broadcast %15 : vector<1x256xf32> to vector<512x256xf32>
    %17 = arith.addf %14, %16 : vector<512x256xf32>
    %cst_12 = arith.constant 0.000000e+00 : f32
    %18 = vector.broadcast %cst_12 : f32 to vector<512x256xf32>
    %19 = arith.cmpf oge, %17, %18 : vector<512x256xf32>
    %cst_13 = arith.constant 2.000000e-01 : f32
    %20 = vector.broadcast %cst_13 : f32 to vector<512x256xf32>
    %21 = arith.mulf %20, %17 : vector<512x256xf32>
    %22 = arith.select %19, %17, %21 : vector<512x256xi1>, vector<512x256xf32>
    %c0_14 = arith.constant 0 : index
    %c0_15 = arith.constant 0 : index
    %23 = vector.load %arg6[%c0_14, %c0_15] : memref<8x256xbf16, #tpu.memory_space<vmem>>, vector<8x256xbf16>
    %24 = arith.truncf %22 : vector<512x256xf32> to vector<512x256xbf16>
    %cst_16 = arith.constant dense<0.000000e+00> : vector<8x512xf32>
    %25 = tpu.matmul %23, %24, %cst_16 {dimension_numbers = #tpu.dot_dimension_numbers<[1], [1], [0], [0], [0, 0, 1, 0], [], []>} : vector<8x256xbf16>, vector<512x256xbf16>, vector<8x512xf32> -> vector<8x512xf32>
    %c0_17 = arith.constant 0 : index
    %26 = memref.load %arg7[%c0_17] : memref<1xf32, #tpu.memory_space<smem>>
    %27 = vector.broadcast %26 : f32 to vector<8x512xf32>
    %28 = arith.addf %25, %27 : vector<8x512xf32>
    %cst_18 = arith.constant -3.000000e+01 : f32
    %29 = vector.broadcast %cst_18 : f32 to vector<8x512xf32>
    %30 = arith.maximumf %28, %29 : vector<8x512xf32>
    %cst_19 = arith.constant 0.000000e+00 : f32
    %31 = vector.broadcast %cst_19 : f32 to vector<8x512xf32>
    %32 = arith.subf %31, %30 : vector<8x512xf32>
    %33 = math.exp %32 : vector<8x512xf32>
    %cst_20 = arith.constant 1.000000e+00 : f32
    %34 = vector.broadcast %cst_20 : f32 to vector<8x512xf32>
    %35 = arith.addf %34, %33 : vector<8x512xf32>
    %36 = tpu.reciprocal %35 {approx = true} : vector<8x512xf32> -> vector<8x512xf32>
    %c0_21 = arith.constant 0 : index
    %c0_22 = arith.constant 0 : index
    %37 = vector.load %arg8[%c0_21, %c0_22] : memref<8x512xf32, #tpu.memory_space<vmem>>, vector<8x512xf32>
    tpu.vector_store %arg8[%c0_21, %c0_22], %36 {strides = array<i32>} : memref<8x512xf32, #tpu.memory_space<vmem>>, vector<8x512xf32>,
    return
  }
  func.func @transform_0(%arg0: i32) -> (i32, i32) {
    %c0_i32 = arith.constant 0 : i32
    %c0_i32_0 = arith.constant 0 : i32
    return %arg0, %c0_i32 : i32, i32
  }
  func.func @transform_1(%arg0: i32) -> (i32, i32) {
    %c0_i32 = arith.constant 0 : i32
    %c0_i32_0 = arith.constant 0 : i32
    %c0_i32_1 = arith.constant 0 : i32
    return %c0_i32, %c0_i32_0 : i32, i32
  }
  func.func @transform_2(%arg0: i32) -> (i32, i32) {
    %c0_i32 = arith.constant 0 : i32
    %c0_i32_0 = arith.constant 0 : i32
    %c0_i32_1 = arith.constant 0 : i32
    return %c0_i32, %c0_i32_0 : i32, i32
  }
  func.func @transform_3(%arg0: i32) -> (i32, i32) {
    %c0_i32 = arith.constant 0 : i32
    %c0_i32_0 = arith.constant 0 : i32
    %c0_i32_1 = arith.constant 0 : i32
    return %c0_i32, %c0_i32_0 : i32, i32
  }
  func.func @transform_4(%arg0: i32) -> (i32, i32) {
    %c0_i32 = arith.constant 0 : i32
    %c0_i32_0 = arith.constant 0 : i32
    %c0_i32_1 = arith.constant 0 : i32
    return %c0_i32, %c0_i32_0 : i32, i32
  }
  func.func @transform_5(%arg0: i32) -> (i32, i32) {
    %c0_i32 = arith.constant 0 : i32
    %c0_i32_0 = arith.constant 0 : i32
    %c0_i32_1 = arith.constant 0 : i32
    return %c0_i32, %c0_i32_0 : i32, i32
  }
  func.func @transform_6(%arg0: i32) -> i32 {
    %c0_i32 = arith.constant 0 : i32
    %c0_i32_0 = arith.constant 0 : i32
    return %c0_i32 : i32
  }
  func.func @transform_7(%arg0: i32) -> (i32, i32) {
    %c0_i32 = arith.constant 0 : i32
    %c0_i32_0 = arith.constant 0 : i32
    return %c0_i32, %arg0 : i32, i32
  }
}

</mosaic_0001>

<bundles_post_ra>
// kernel: discriminator_forward.1
= control target key start
LH: loop header
LB: loop body
LE: loop exit
PB: predicated region body
PF: predicated region fallthrough
CT: control target
= control target key end

     0   :  { %13 = vsyncpa [#allocation4], 0  ;;  %s3430_s0 = inlined_call_operand.hbm [shape: f32[512,128], index: 0, kind: input, shape index: {}]   ;;  %s3431_s1 = inlined_call_operand.hbm [shape: bf16[128,256], index: 1, kind: input, shape index: {}]   ;;  %s3432_s2 = inlined_call_operand.vmem [shape: f32[1,256], index: 2, kind: input, shape index: {}]   ;;  %s3433_s3 = inlined_call_operand.hbm [shape: bf16[256,256], index: 3, kind: input, shape index: {}]   ;;  %s3434_s4 = inlined_call_operand.hbm [shape: f32[1,256], index: 4, kind: input, shape index: {}]   ;;  %s3435_s5 = inlined_call_operand.vmem [shape: bf16[8,256], index: 5, kind: input, shape index: {}]   ;;  %s3436_s6 = inlined_call_operand.<no memory space> [shape: f32[1], index: 6, kind: input, shape index: {}]   ;;  %s3437_s7 = inlined_call_operand.vmem [shape: f32[8,512], index: 7, kind: output, shape index: {}]  }
   0x1   :  { %14 = vsyncpa [#allocation6], 0 }
   0x2   :  { %15 = vsyncpa [#allocation9], 0  ;;  %s2451_s24 = smov [#allocation5]   ;;  %s2452_s26 = smov [#allocation3]  }
   0x3   :  { %s33_s25 = sshll.u32 %s2451_s24, 4  ;;  %s21_s27 = sshll.u32 %s2452_s26, 4  ;;  %s34_s25 = int_to_ptr.vmem [resolvable:$true] %s33_s25  ;;  %s22_s27 = int_to_ptr.vmem [resolvable:$true] %s21_s27 }
   0x4   :  { %s2373_s28 = scalar_lea.vmem %s34_s25, 2048  ;;  %p2378_p1 = scmp.lt.s32.totalorder %s34_s25, %s34_s25 }
   0x5   :  { %p2374_p0 = scmp.ne.s32.totalorder %s34_s25, %s2373_s28  ;;  %p2379_p2 = scmp.lt.s32.totalorder %s2373_s28, %s2373_s28 }
   0x7   :  { %p2380_p3 = por %p2379_p2, %p2378_p1 }
   0x9   :  { %p2381_p4 = pnand %p2380_p3, %p2374_p0 }
   0xb   :  { %2384 = shalt.err (!%p2381_p4)
}
   0xc   :  { %s2453_s29 = smov 128   ;;  %s2454_s30 = smov 8  }
   0xd   :  { %39 = dma.hbm_to_vmem [thread:$0]  %s3431_s1, 2048, %s34_s25, [#allocation6], %s2453_s29, %s2453_s29, %s2454_s30  }
   0xe   :  { %s2393_s10 = scalar_lea.vmem %s22_s27, 8192  ;;  %p2398_p6 = scmp.lt.s32.totalorder %s22_s27, %s22_s27 }
   0xf   :  { %p2394_p5 = scmp.ne.s32.totalorder %s22_s27, %s2393_s10  ;;  %p2399_p7 = scmp.lt.s32.totalorder %s2393_s10, %s2393_s10 }
  0x11   :  { %p2400_p8 = por %p2399_p7, %p2398_p6 }
  0x13   :  { %p2401_p9 = pnand %p2400_p8, %p2394_p5 }
  0x15   :  { %2404 = shalt.err (!%p2401_p9)
}
  0x16   :  { %27 = dma.hbm_to_vmem [thread:$0]  %s3430_s0, 8192, %s22_s27, [#allocation4], %s2453_s29, %s2453_s29, %s2454_s30  }
  0x17   :  { %s2455_s13 = smov [#allocation7]   ;;  %s2456_s15 = smov [#allocation8]  }
  0x18   :  { %s47_s14 = sshll.u32 %s2455_s13, 4  ;;  %s60_s16 = sshll.u32 %s2456_s15, 4  ;;  %s48_s14 = int_to_ptr.vmem [resolvable:$true] %s47_s14  ;;  %s61_s16 = int_to_ptr.vmem [resolvable:$true] %s60_s16 }
  0x19   :  { %s2413_s17 = scalar_lea.vmem %s48_s14, 4096  ;;  %p2418_p11 = scmp.lt.s32.totalorder %s48_s14, %s48_s14 }
  0x1a   :  { %p2414_p10 = scmp.ne.s32.totalorder %s48_s14, %s2413_s17  ;;  %p2419_p12 = scmp.lt.s32.totalorder %s2413_s17, %s2413_s17 }
  0x1c   :  { %p2420_p13 = por %p2419_p12, %p2418_p11 }
  0x1e   :  { %p2421_p0 = pnand %p2420_p13, %p2414_p10 }
  0x20   :  { %2424 = shalt.err (!%p2421_p0)
}
  0x21   :  { %53 = dma.hbm_to_vmem [thread:$0]  %s3433_s3, 4096, %s48_s14, [#allocation6], %s2453_s29, %s2453_s29, %s2454_s30  }
  0x22   :  { %s2433_s19 = scalar_lea.vmem %s61_s16, 32  ;;  %p2438_p2 = scmp.lt.s32.totalorder %s61_s16, %s61_s16 }
  0x23   :  { %p2434_p1 = scmp.ne.s32.totalorder %s61_s16, %s2433_s19  ;;  %p2439_p3 = scmp.lt.s32.totalorder %s2433_s19, %s2433_s19 }
  0x25   :  { %p2440_p4 = por %p2439_p3, %p2438_p2 }
  0x27   :  { %p2441_p5 = pnand %p2440_p4, %p2434_p1 }
  0x29   :  { %2444 = shalt.err (!%p2441_p5)
}
  0x2a   :  { %63 = dma.hbm_to_vmem [thread:$0]  %s3434_s4, 32, %s61_s16, [#allocation9]  }
  0x2b   :  { %2445 = dma.done.wait [#allocation4], 8192  }
  0x2c   :  { %2446 = vsyncadd [#allocation4], 4294959104 }
  0x2d   :  { %2447 = dma.done.wait [#allocation6], 6144  }
  0x2e   :  { %2448 = vsyncadd [#allocation6], 4294961152 }
  0x2f   :  { %2449 = dma.done.wait [#allocation9], 32  }
  0x30   :  { %2450 = vsyncadd [#allocation9], 4294967264  ;;  %v2457_v0 = vmov 0   ;;  %v2275_v1 = vld [vmem:[#allocation5 + $0x74] ss:$8 sps:$4 sm:$0xff]   ;;  %v81_v17 = vld [vmem:[#allocation3] sm:$0xff] }
  0x31   :  { %317 = vmatprep.mubr.bf16.mxu0 %v2457_v0  ;;  %v2277_v2 = vld [vmem:[#allocation5 + $0x70] ss:$8 sps:$4 sm:$0xff]   ;;  %285 = vmatprep.subr.bf16.mxu0 %v2275_v1  ;;  %v2278_v3 = vld [vmem:[#allocation5 + $0x64] ss:$8 sps:$4 sm:$0xff]   ;;  %v2280_v4 = vld [vmem:[#allocation5 + $0x60] ss:$8 sps:$4 sm:$0xff]  }
  0x32   :  { %286 = vmatpush1.bf16.msra.mxu0 %v2277_v2  ;;  %v2281_v5 = vld [vmem:[#allocation5 + $0x54] ss:$8 sps:$4 sm:$0xff]   ;;  %v2283_v6 = vld [vmem:[#allocation5 + $0x50] ss:$8 sps:$4 sm:$0xff]   ;;  %v2284_v7 = vld [vmem:[#allocation5 + $0x44] ss:$8 sps:$4 sm:$0xff]  }
  0x33   :  { %287 = vmatprep.subr.bf16.mxu0 %v2278_v3  ;;  %v2286_v8 = vld [vmem:[#allocation5 + $0x40] ss:$8 sps:$4 sm:$0xff]   ;;  %v2287_v9 = vld [vmem:[#allocation5 + $0x34] ss:$8 sps:$4 sm:$0xff]   ;;  %v2289_v10 = vld [vmem:[#allocation5 + $0x30] ss:$8 sps:$4 sm:$0xff]  }
  0x34   :  { %v2290_v11 = vld [vmem:[#allocation5 + $0x24] ss:$8 sps:$4 sm:$0xff]   ;;  %v2292_v12 = vld [vmem:[#allocation5 + $0x20] ss:$8 sps:$4 sm:$0xff]   ;;  %v2293_v13 = vld [vmem:[#allocation5 + $0x14] ss:$8 sps:$4 sm:$0xff]  }
  0x35   :  { %v2295_v14 = vld [vmem:[#allocation5 + $0x10] ss:$8 sps:$4 sm:$0xff]   ;;  %v2296_v15 = vld [vmem:[#allocation5 + $0x4] ss:$8 sps:$4 sm:$0xff]   ;;  %v2298_v16 = vld [vmem:[#allocation5] ss:$8 sps:$4 sm:$0xff]  }
  0x36   :  { %288 = vmatpush1.bf16.msra.mxu0 %v2280_v4  ;;  %v82_v18 = vld [vmem:[#allocation3 + $0x8] sm:$0xff]  ;;  %v83_v20 = vld [vmem:[#allocation3 + $0x10] sm:$0xff]  ;;  %v84_v21 = vld [vmem:[#allocation3 + $0x18] sm:$0xff] }
  0x37   :  { %289 = vmatprep.subr.bf16.mxu0 %v2281_v5  ;;  %v145_v19 = vpack.c.bf16 %v82_v18, %v81_v17  ;;  %v146_v22 = vpack.c.bf16 %v84_v21, %v83_v20  ;;  %v85_v23 = vld [vmem:[#allocation3 + $0x20] sm:$0xff]  ;;  %v86_v24 = vld [vmem:[#allocation3 + $0x28] sm:$0xff]  ;;  %v2299_v25 = vld [vmem:[#allocation7 + $0x74] ss:$8 sps:$4 sm:$0xff]  }
  0x38   :  { %1290 = vmatprep.subr.bf16.mxu1 %v2299_v25  ;;  %v147_v26 = vpack.c.bf16 %v86_v24, %v85_v23  ;;  %v2301_v27 = vld [vmem:[#allocation7 + $0x70] ss:$8 sps:$4 sm:$0xff]   ;;  %v2302_v28 = vld [vmem:[#allocation7 + $0x64] ss:$8 sps:$4 sm:$0xff]   ;;  %v2304_v29 = vld [vmem:[#allocation7 + $0x60] ss:$8 sps:$4 sm:$0xff]  }
  0x39   :  { %1291 = vmatpush1.bf16.msra.mxu1 %v2301_v27  ;;  %v87_v30 = vld [vmem:[#allocation3 + $0x30] sm:$0xff]  ;;  %v88_v31 = vld [vmem:[#allocation3 + $0x38] sm:$0xff]  ;;  %v2308_v35 = vld [vmem:[#allocation7 + $0x44] ss:$8 sps:$4 sm:$0xff]  }
  0x3a   :  { %290 = vmatpush1.bf16.msra.mxu0 %v2283_v6  ;;  %v2305_v32 = vld [vmem:[#allocation7 + $0x54] ss:$8 sps:$4 sm:$0xff]   ;;  %1292 = vmatprep.subr.bf16.mxu1 %v2302_v28  ;;  %v148_v33 = vpack.c.bf16 %v88_v31, %v87_v30  ;;  %v2307_v34 = vld [vmem:[#allocation7 + $0x50] ss:$8 sps:$4 sm:$0xff]   ;;  %v2310_v36 = vld [vmem:[#allocation7 + $0x40] ss:$8 sps:$4 sm:$0xff]  }
  0x3b   :  { %291 = vmatprep.subr.bf16.mxu0 %v2284_v7  ;;  %v89_v37 = vld [vmem:[#allocation3 + $0x40] sm:$0xff]  ;;  %v90_v38 = vld [vmem:[#allocation3 + $0x48] sm:$0xff]  ;;  %v2311_v39 = vld [vmem:[#allocation7 + $0x34] ss:$8 sps:$4 sm:$0xff]  }
  0x3c   :  { %v149_v40 = vpack.c.bf16 %v90_v38, %v89_v37  ;;  %v2313_v41 = vld [vmem:[#allocation7 + $0x30] ss:$8 sps:$4 sm:$0xff]   ;;  %v2314_v42 = vld [vmem:[#allocation7 + $0x24] ss:$8 sps:$4 sm:$0xff]   ;;  %v2316_v43 = vld [vmem:[#allocation7 + $0x20] ss:$8 sps:$4 sm:$0xff]  }
  0x3d   :  { %1293 = vmatpush1.bf16.msra.mxu1 %v2304_v29  ;;  %v91_v44 = vld [vmem:[#allocation3 + $0x50] sm:$0xff]  ;;  %v92_v45 = vld [vmem:[#allocation3 + $0x58] sm:$0xff]  ;;  %v2320_v49 = vld [vmem:[#allocation7 + $0x4] ss:$8 sps:$4 sm:$0xff]  }
  0x3e   :  { %292 = vmatpush1.bf16.msra.mxu0 %v2286_v8  ;;  %1294 = vmatprep.subr.bf16.mxu1 %v2305_v32  ;;  %v2317_v46 = vld [vmem:[#allocation7 + $0x14] ss:$8 sps:$4 sm:$0xff]   ;;  %v150_v47 = vpack.c.bf16 %v92_v45, %v91_v44  ;;  %v2319_v48 = vld [vmem:[#allocation7 + $0x10] ss:$8 sps:$4 sm:$0xff]   ;;  %v2322_v50 = vld [vmem:[#allocation7] ss:$8 sps:$4 sm:$0xff]  }
  0x3f   :  { %293 = vmatprep.subr.bf16.mxu0 %v2287_v9  ;;  %v93_v51 = vld [vmem:[#allocation3 + $0x60] sm:$0xff]  ;;  %v94_v52 = vld [vmem:[#allocation3 + $0x68] sm:$0xff]  ;;  %v2323_v53 = vld [vmem:[#allocation7 + $0xf4] ss:$8 sps:$4 sm:$0xff]  }
  0x40   :  { %v151_v54 = vpack.c.bf16 %v94_v52, %v93_v51  ;;  %v2325_v55 = vld [vmem:[#allocation7 + $0xf0] ss:$8 sps:$4 sm:$0xff]   ;;  %v2326_v56 = vld [vmem:[#allocation7 + $0xe4] ss:$8 sps:$4 sm:$0xff]   ;;  %v2328_v57 = vld [vmem:[#allocation7 + $0xe0] ss:$8 sps:$4 sm:$0xff]  }
  0x41   :  { %1295 = vmatpush1.bf16.msra.mxu1 %v2307_v34  ;;  %v95_v58 = vld [vmem:[#allocation3 + $0x70] sm:$0xff]  ;;  %v96_v59 = vld [vmem:[#allocation3 + $0x78] sm:$0xff]  ;;  %v2332_v63 = vld [vmem:[#allocation7 + $0xc4] ss:$8 sps:$4 sm:$0xff]  }
  0x42   :  { %294 = vmatpush1.bf16.msra.mxu0 %v2289_v10  ;;  %1296 = vmatprep.subr.bf16.mxu1 %v2308_v35  ;;  %v2329_v60 = vld [vmem:[#allocation7 + $0xd4] ss:$8 sps:$4 sm:$0xff]   ;;  %v152_v61 = vpack.c.bf16 %v96_v59, %v95_v58  ;;  %v2331_v62 = vld [vmem:[#allocation7 + $0xd0] ss:$8 sps:$4 sm:$0xff]   ;;  %v2334_v1 = vld [vmem:[#allocation7 + $0xc0] ss:$8 sps:$4 sm:$0xff]   ;;  %v195_v58 = vlaneseq }
  0x43   :  { %295 = vmatprep.subr.bf16.mxu0 %v2290_v11  ;;  %v97_v2 = vld [vmem:[#allocation3 + $0x80] sm:$0xff]  ;;  %v98_v3 = vld [vmem:[#allocation3 + $0x88] sm:$0xff]  ;;  %v2335_v4 = vld [vmem:[#allocation7 + $0xb4] ss:$8 sps:$4 sm:$0xff]  }
  0x44   :  { %v153_v5 = vpack.c.bf16 %v98_v3, %v97_v2  ;;  %v2337_v6 = vld [vmem:[#allocation7 + $0xb0] ss:$8 sps:$4 sm:$0xff]   ;;  %v2338_v9 = vld [vmem:[#allocation7 + $0xa4] ss:$8 sps:$4 sm:$0xff]   ;;  %v2340_v10 = vld [vmem:[#allocation7 + $0xa0] ss:$8 sps:$4 sm:$0xff]  }
  0x45   :  { %1297 = vmatpush1.bf16.msra.mxu1 %v2310_v36  ;;  %v99_v7 = vld [vmem:[#allocation3 + $0x90] sm:$0xff]  ;;  %v100_v8 = vld [vmem:[#allocation3 + $0x98] sm:$0xff]  ;;  %v2346_v17 = vld [vmem:[#allocation7 + $0x80] ss:$8 sps:$4 sm:$0xff]   ;;  %v2534_v59 = vshrl.u32 %v195_v58, 7 }
  0x46   :  { %296 = vmatpush1.bf16.msra.mxu0 %v2292_v12  ;;  %1298 = vmatprep.subr.bf16.mxu1 %v2311_v39  ;;  %v154_v11 = vpack.c.bf16 %v100_v8, %v99_v7  ;;  %v2341_v12 = vld [vmem:[#allocation7 + $0x94] ss:$8 sps:$4 sm:$0xff]   ;;  %v106_v23 = vld [vmem:[#allocation3 + $0xc8] sm:$0xff]  ;;  %v109_v28 = vld [vmem:[#allocation3 + $0xe0] sm:$0xff] }
  0x47   :  { %297 = vmatprep.subr.bf16.mxu0 %v2293_v13  ;;  %v2343_v13 = vld [vmem:[#allocation7 + $0x90] ss:$8 sps:$4 sm:$0xff]   ;;  %v110_v29 = vld [vmem:[#allocation3 + $0xe8] sm:$0xff]  ;;  %v113_v34 = vld [vmem:[#allocation3 + $0x100] sm:$0xff] }
  0x48   :  { %v104_v20 = vld [vmem:[#allocation3 + $0xb8] sm:$0xff]  ;;  %v107_v25 = vld [vmem:[#allocation3 + $0xd0] sm:$0xff]  ;;  %v159_v30 = vpack.c.bf16 %v110_v29, %v109_v28  ;;  %v114_v35 = vld [vmem:[#allocation3 + $0x108] sm:$0xff] }
  0x49   :  { %1299 = vmatpush1.bf16.msra.mxu1 %v2313_v41  ;;  %v111_v31 = vld [vmem:[#allocation3 + $0xf0] sm:$0xff]  ;;  %v112_v32 = vld [vmem:[#allocation3 + $0xf8] sm:$0xff]  ;;  %v161_v36 = vpack.c.bf16 %v114_v35, %v113_v34  ;;  %v118_v41 = vld [vmem:[#allocation3 + $0x128] sm:$0xff] }
  0x4a   :  { %298 = vmatpush1.bf16.msra.mxu0 %v2295_v14  ;;  %1300 = vmatprep.subr.bf16.mxu1 %v2314_v42  ;;  %v101_v14 = vld [vmem:[#allocation3 + $0xa0] sm:$0xff]  ;;  %v115_v37 = vld [vmem:[#allocation3 + $0x110] sm:$0xff]  ;;  %v116_v38 = vld [vmem:[#allocation3 + $0x118] sm:$0xff] }
  0x4b   :  { %299 = vmatprep.subr.bf16.mxu0 %v2296_v15  ;;  %v102_v15 = vld [vmem:[#allocation3 + $0xa8] sm:$0xff]  ;;  %v162_v39 = vpack.c.bf16 %v116_v38, %v115_v37  ;;  %v120_v44 = vld [vmem:[#allocation3 + $0x138] sm:$0xff]  ;;  %v125_v52 = vld [vmem:[#allocation3 + $0x160] sm:$0xff] }
  0x4c   :  { %v155_v18 = vpack.c.bf16 %v102_v15, %v101_v14  ;;  %v193_v2 = vld [vmem:[%s3432_s2] sm:$0x3]  ;;  %v132_v7 = vld [vmem:[#allocation3 + $0x198] sm:$0xff] }
  0x4d   :  { %1301 = vmatpush1.bf16.msra.mxu1 %v2316_v43  ;;  %v119_v43 = vld [vmem:[#allocation3 + $0x130] sm:$0xff] }
  0x4e   :  { %300 = vmatpush1.bf16.msra.mxu0 %v2298_v16  ;;  %1302 = vmatprep.subr.bf16.mxu1 %v2317_v46  ;;  %v2344_v16 = vld [vmem:[#allocation7 + $0x84] ss:$8 sps:$4 sm:$0xff]   ;;  %v164_v45 = vpack.c.bf16 %v120_v44, %v119_v43  ;;  %v136_v43 = vld [vmem:[#allocation3 + $0x1b8] sm:$0xff] }
  0x4f   :  { %v121_v46 = vld [vmem:[#allocation3 + $0x140] sm:$0xff] }
  0x51   :  { %318 = vmatmul.mubr.bf16.vlgmr.msra.gmra.mxu0 %v145_v19  ;;  %1303 = vmatpush1.bf16.msra.mxu1 %v2319_v48  ;;  %v103_v19 = vld [vmem:[#allocation3 + $0xb0] sm:$0xff] }
  0x52   :  { %327 = vmatprep.mubr.bf16.mxu0 %v2457_v0  ;;  %1304 = vmatprep.subr.bf16.mxu1 %v2320_v49  ;;  %v156_v21 = vpack.c.bf16 %v104_v20, %v103_v19  ;;  %v123_v49 = vld [vmem:[#allocation3 + $0x150] sm:$0xff] }
  0x55   :  { %1305 = vmatpush1.bf16.msra.mxu1 %v2322_v50  ;;  %v124_v50 = vld [vmem:[#allocation3 + $0x158] sm:$0xff] }
  0x56   :  { %1306 = vmatprep.subr.bf16.mxu1 %v2323_v53  ;;  %v166_v51 = vpack.c.bf16 %v124_v50, %v123_v49  ;;  %v126_v53 = vld [vmem:[#allocation3 + $0x168] sm:$0xff] }
  0x59   :  { %328 = vmatmul.mubr.bf16.gmra.mxu0 %v146_v22  ;;  %1307 = vmatpush2.bf16.msra.mxu1 %v2325_v55  ;;  %v105_v22 = vld [vmem:[#allocation3 + $0xc0] sm:$0xff]  ;;  %v127_v55 = vld [vmem:[#allocation3 + $0x170] sm:$0xff] }
  0x5a   :  { %337 = vmatprep.mubr.bf16.mxu0 %v2457_v0  ;;  %1308 = vmatprep.subr.bf16.mxu1 %v2326_v56  ;;  %v157_v24 = vpack.c.bf16 %v106_v23, %v105_v22  ;;  %v128_v56 = vld [vmem:[#allocation3 + $0x178] sm:$0xff]  ;;  %v134_v22 = vld [vmem:[#allocation3 + $0x1a8] sm:$0xff] }
  0x5d   :  { %1309 = vmatpush2.bf16.msra.mxu1 %v2328_v57  ;;  %v168_v57 = vpack.c.bf16 %v128_v56, %v127_v55 }
  0x5e   :  { %1310 = vmatprep.subr.bf16.mxu1 %v2329_v60  ;;  %v129_v60 = vld [vmem:[#allocation3 + $0x180] sm:$0xff] }
  0x61   :  { %338 = vmatmul.mubr.bf16.gmra.mxu0 %v147_v26  ;;  %1311 = vmatpush2.bf16.msra.mxu1 %v2331_v62  ;;  %v108_v26 = vld [vmem:[#allocation3 + $0xd8] sm:$0xff]  ;;  %v201_v62 = vsub.s32 1, %v2534_v59 }
  0x62   :  { %347 = vmatprep.mubr.bf16.mxu0 %v2457_v0  ;;  %1312 = vmatprep.subr.bf16.mxu1 %v2332_v63  ;;  %v158_v27 = vpack.c.bf16 %v108_v26, %v107_v25  ;;  %v197_v63 = vsub.s32 0, %v2534_v59 }
  0x63   :  { %v2544_v3 = vrot.slane %v193_v2, %v201_v62 }
  0x65   :  { %1313 = vmatpush2.bf16.msra.mxu1 %v2334_v1 }
  0x66   :  { %1314 = vmatprep.subr.bf16.mxu1 %v2335_v4  ;;  %v2548_v4 = vrot.slane %v193_v2, %v197_v63 }
  0x69   :  { %348 = vmatmul.mubr.bf16.gmra.mxu0 %v148_v33  ;;  %1315 = vmatpush2.bf16.msra.mxu1 %v2337_v6  ;;  %v160_v33 = vpack.c.bf16 %v112_v32, %v111_v31  ;;  %v131_v6 = vld [vmem:[#allocation3 + $0x190] sm:$0xff] }
  0x6a   :  { %357 = vmatprep.mubr.bf16.mxu0 %v2457_v0  ;;  %1316 = vmatprep.subr.bf16.mxu1 %v2338_v9 }
  0x6d   :  { %1317 = vmatpush2.bf16.msra.mxu1 %v2340_v10 }
  0x6e   :  { %1318 = vmatprep.subr.bf16.mxu1 %v2341_v12  ;;  %v170_v12 = vpack.c.bf16 %v132_v7, %v131_v6  ;;  %v138_v6 = vld [vmem:[#allocation3 + $0x1c8] sm:$0xff] }
  0x71   :  { %358 = vmatmul.mubr.bf16.gmra.mxu0 %v149_v40  ;;  %1319 = vmatpush2.bf16.msra.mxu1 %v2343_v13  ;;  %v117_v40 = vld [vmem:[#allocation3 + $0x120] sm:$0xff] }
  0x72   :  { %367 = vmatprep.mubr.bf16.mxu0 %v2457_v0  ;;  %1320 = vmatprep.subr.bf16.mxu1 %v2344_v16  ;;  %v163_v42 = vpack.c.bf16 %v118_v41, %v117_v40 }
  0x75   :  { %1321 = vmatpush2.bf16.msra.mxu1 %v2346_v17 }
  0x79   :  { %368 = vmatmul.mubr.bf16.gmra.mxu0 %v150_v47  ;;  %v122_v47 = vld [vmem:[#allocation3 + $0x148] sm:$0xff] }
  0x7a   :  { %377 = vmatprep.mubr.bf16.mxu0 %v2457_v0  ;;  %v165_v48 = vpack.c.bf16 %v122_v47, %v121_v46 }
  0x81   :  { %378 = vmatmul.mubr.bf16.gmra.mxu0 %v151_v54  ;;  %v167_v54 = vpack.c.bf16 %v126_v53, %v125_v52 }
  0x82   :  { %387 = vmatprep.mubr.bf16.mxu0 %v2457_v0 }
  0x89   :  { %388 = vmatmul.mubr.bf16.gmra.mxu0 %v152_v61  ;;  %v130_v61 = vld [vmem:[#allocation3 + $0x188] sm:$0xff] }
  0x8a   :  { %397 = vmatprep.mubr.bf16.mxu0 %v2457_v0  ;;  %v169_v1 = vpack.c.bf16 %v130_v61, %v129_v60 }
  0x91   :  { %398 = vmatmul.mubr.bf16.gmra.mxu0 %v153_v5 }
  0x92   :  { %407 = vmatprep.mubr.bf16.mxu0 %v2457_v0 }
  0x99   :  { %408 = vmatmul.mubr.bf16.gmra.mxu0 %v154_v11 }
  0x9a   :  { %417 = vmatprep.mubr.bf16.mxu0 %v2457_v0 }
  0xa1   :  { %418 = vmatmul.mubr.bf16.gmra.mxu0 %v155_v18 }
  0xa2   :  { %427 = vmatprep.mubr.bf16.mxu0 %v2457_v0 }
  0xa9   :  { %428 = vmatmul.mubr.bf16.gmra.mxu0 %v156_v21  ;;  %v133_v21 = vld [vmem:[#allocation3 + $0x1a0] sm:$0xff] }
  0xaa   :  { %437 = vmatprep.mubr.bf16.mxu0 %v2457_v0  ;;  %v171_v32 = vpack.c.bf16 %v134_v22, %v133_v21 }
  0xb1   :  { %438 = vmatmul.mubr.bf16.gmra.mxu0 %v157_v24 }
  0xb2   :  { %447 = vmatprep.mubr.bf16.mxu0 %v2457_v0 }
  0xb9   :  { %448 = vmatmul.mubr.bf16.gmra.mxu0 %v158_v27 }
  0xba   :  { %457 = vmatprep.mubr.bf16.mxu0 %v2457_v0 }
  0xc1   :  { %458 = vmatmul.mubr.bf16.gmra.mxu0 %v159_v30 }
  0xc2   :  { %467 = vmatprep.mubr.bf16.mxu0 %v2457_v0 }
  0xc9   :  { %468 = vmatmul.mubr.bf16.gmra.mxu0 %v160_v33 }
  0xca   :  { %477 = vmatprep.mubr.bf16.mxu0 %v2457_v0 }
  0xd1   :  { %478 = vmatmul.mubr.bf16.gmra.mxu0 %v161_v36 }
  0xd2   :  { %487 = vmatprep.mubr.bf16.mxu0 %v2457_v0 }
  0xd9   :  { %488 = vmatmul.mubr.bf16.gmra.mxu0 %v162_v39 }
  0xda   :  { %497 = vmatprep.mubr.bf16.mxu0 %v2457_v0 }
  0xe1   :  { %498 = vmatmul.mubr.bf16.gmra.mxu0 %v163_v42  ;;  %v135_v42 = vld [vmem:[#allocation3 + $0x1b0] sm:$0xff] }
  0xe2   :  { %507 = vmatprep.mubr.bf16.mxu0 %v2457_v0  ;;  %v172_v53 = vpack.c.bf16 %v136_v43, %v135_v42 }
  0xe9   :  { %508 = vmatmul.mubr.bf16.gmra.mxu0 %v164_v45 }
  0xea   :  { %517 = vmatprep.mubr.bf16.mxu0 %v2457_v0 }
  0xf1   :  { %518 = vmatmul.mubr.bf16.gmra.mxu0 %v165_v48 }
  0xf2   :  { %527 = vmatprep.mubr.bf16.mxu0 %v2457_v0 }
  0xf9   :  { %528 = vmatmul.mubr.bf16.gmra.mxu0 %v166_v51 }
  0xfa   :  { %537 = vmatprep.mubr.bf16.mxu0 %v2457_v0 }
 0x101   :  { %538 = vmatmul.mubr.bf16.gmra.mxu0 %v167_v54 }
 0x102   :  { %547 = vmatprep.mubr.bf16.mxu0 %v2457_v0 }
 0x109   :  { %548 = vmatmul.mubr.bf16.gmra.mxu0 %v168_v57 }
 0x10a   :  { %557 = vmatprep.mubr.bf16.mxu0 %v2457_v0 }
 0x111   :  { %v319_v5 = vpop.f32.mrf.mxu0  ;;  %558 = vmatmul.mubr.bf16.gmra.mxu0 %v169_v1 }
 0x112   :  { %567 = vmatprep.mubr.bf16.mxu0 %v2457_v0  ;;  %v320_v10 = vadd.f32 %v319_v5, %v2548_v4  ;;  %v137_v5 = vld [vmem:[#allocation3 + $0x1c0] sm:$0xff] }
 0x113   :  { %v321_v8 = vpop.f32.mrf.mxu0 }
 0x114   :  { %v322_v9 = vadd.f32 %v321_v8, %v2544_v3  ;;  %v766_v18 = vmul.f32 0.2, %v320_v10  ;;  %vm638_vm2 = vcmp.ge.f32.partialorder %v320_v10, 0.0 }
 0x115   :  { %v323_v11 = vpop.f32.mrf.mxu0 }
 0x116   :  { %v324_v13 = vadd.f32 %v323_v11, %v2548_v4  ;;  %v767_v15 = vmul.f32 0.2, %v322_v9  ;;  %vm639_vm1 = vcmp.ge.f32.partialorder %v322_v9, 0.0  ;;  %v894_v31 = vsel %vm638_vm2, %v320_v10, %v766_v18 }
 0x117   :  { %v325_v14 = vpop.f32.mrf.mxu0 }
 0x118   :  { %vm640_vm0 = vcmp.ge.f32.partialorder %v324_v13, 0.0  ;;  %v768_v16 = vmul.f32 0.2, %v324_v13  ;;  %v326_v17 = vadd.f32 %v325_v14, %v2544_v3  ;;  %v895_v26 = vsel %vm639_vm1, %v322_v9, %v767_v15 }
 0x119   :  { %v329_v19 = vpop.f32.mrf.mxu0  ;;  %568 = vmatmul.mubr.bf16.gmra.mxu0 %v170_v12 }
 0x11a   :  { %vm641_vm3 = vcmp.ge.f32.partialorder %v326_v17, 0.0  ;;  %v769_v20 = vmul.f32 0.2, %v326_v17  ;;  %577 = vmatprep.mubr.bf16.mxu0 %v2457_v0  ;;  %v896_v24 = vsel %vm640_vm0, %v324_v13, %v768_v16  ;;  %v330_v28 = vadd.f32 %v329_v19, %v2548_v4 }
 0x11b   :  { %v331_v23 = vpop.f32.mrf.mxu0  ;;  %v1022_v34 = vpack.c.bf16 %v896_v24, %v894_v31  ;;  %v173_v16 = vpack.c.bf16 %v138_v6, %v137_v5 }
 0x11c   :  { %v332_v25 = vadd.f32 %v331_v23, %v2544_v3  ;;  %v897_v27 = vsel %vm641_vm3, %v326_v17, %v769_v20  ;;  %v770_v39 = vmul.f32 0.2, %v330_v28  ;;  %vm642_vm6 = vcmp.ge.f32.partialorder %v330_v28, 0.0 }
 0x11d   :  { %v333_v29 = vpop.f32.mrf.mxu0  ;;  %v1023_v30 = vpack.c.bf16 %v897_v27, %v895_v26  ;;  %v139_v26 = vld [vmem:[#allocation3 + $0x1d0] sm:$0xff]  ;;  %v140_v27 = vld [vmem:[#allocation3 + $0x1d8] sm:$0xff] }
 0x11e   :  { %v334_v33 = vadd.f32 %v333_v29, %v2548_v4  ;;  %v771_v36 = vmul.f32 0.2, %v332_v25  ;;  %vm643_vm5 = vcmp.ge.f32.partialorder %v332_v25, 0.0  ;;  %v898_v52 = vsel %vm642_vm6, %v330_v28, %v770_v39 }
 0x11f   :  { %v335_v35 = vpop.f32.mrf.mxu0  ;;  %1322 = vmatprep.mubr.bf16.mxu1 %v1023_v30 }
 0x120   :  { %vm644_vm4 = vcmp.ge.f32.partialorder %v334_v33, 0.0  ;;  %v772_v37 = vmul.f32 0.2, %v334_v33  ;;  %v336_v38 = vadd.f32 %v335_v35, %v2544_v3  ;;  %1323 = vmatmul.mubr.bf16.vlgmr.msra.gmra.mxu1 %v1022_v34  ;;  %v899_v47 = vsel %vm643_vm5, %v332_v25, %v771_v36 }
 0x121   :  { %v339_v40 = vpop.f32.mrf.mxu0  ;;  %578 = vmatmul.mubr.bf16.gmra.mxu0 %v171_v32 }
 0x122   :  { %vm645_vm7 = vcmp.ge.f32.partialorder %v336_v38, 0.0  ;;  %v773_v41 = vmul.f32 0.2, %v336_v38  ;;  %587 = vmatprep.mubr.bf16.mxu0 %v2457_v0  ;;  %v900_v45 = vsel %vm644_vm4, %v334_v33, %v772_v37  ;;  %v340_v49 = vadd.f32 %v339_v40, %v2548_v4 }
 0x123   :  { %v341_v44 = vpop.f32.mrf.mxu0  ;;  %v1024_v55 = vpack.c.bf16 %v900_v45, %v898_v52  ;;  %v174_v37 = vpack.c.bf16 %v140_v27, %v139_v26 }
 0x124   :  { %v342_v46 = vadd.f32 %v341_v44, %v2544_v3  ;;  %v901_v48 = vsel %vm645_vm7, %v336_v38, %v773_v41  ;;  %v774_v61 = vmul.f32 0.2, %v340_v49  ;;  %vm646_vm10 = vcmp.ge.f32.partialorder %v340_v49, 0.0 }
 0x125   :  { %v343_v50 = vpop.f32.mrf.mxu0  ;;  %v1025_v51 = vpack.c.bf16 %v901_v48, %v899_v47  ;;  %v141_v47 = vld [vmem:[#allocation3 + $0x1e0] sm:$0xff]  ;;  %v142_v48 = vld [vmem:[#allocation3 + $0x1e8] sm:$0xff] }
 0x126   :  { %v344_v54 = vadd.f32 %v343_v50, %v2548_v4  ;;  %v775_v57 = vmul.f32 0.2, %v342_v46  ;;  %vm647_vm9 = vcmp.ge.f32.partialorder %v342_v46, 0.0  ;;  %v902_v15 = vsel %vm646_vm10, %v340_v49, %v774_v61 }
 0x127   :  { %v345_v56 = vpop.f32.mrf.mxu0  ;;  %1332 = vmatprep.mubr.bf16.mxu1 %v1025_v51 }
 0x128   :  { %vm648_vm8 = vcmp.ge.f32.partialorder %v344_v54, 0.0  ;;  %v776_v58 = vmul.f32 0.2, %v344_v54  ;;  %v346_v60 = vadd.f32 %v345_v56, %v2544_v3  ;;  %1333 = vmatmul.mubr.bf16.gmra.mxu1 %v1024_v55  ;;  %v903_v10 = vsel %vm647_vm9, %v342_v46, %v775_v57 }
 0x129   :  { %v349_v1 = vpop.f32.mrf.mxu0  ;;  %588 = vmatmul.mubr.bf16.gmra.mxu0 %v172_v53 }
 0x12a   :  { %vm649_vm11 = vcmp.ge.f32.partialorder %v346_v60, 0.0  ;;  %v777_v2 = vmul.f32 0.2, %v346_v60  ;;  %597 = vmatprep.mubr.bf16.mxu0 %v2457_v0  ;;  %v904_v8 = vsel %vm648_vm8, %v344_v54, %v776_v58  ;;  %v350_v12 = vadd.f32 %v349_v1, %v2548_v4 }
 0x12b   :  { %v351_v7 = vpop.f32.mrf.mxu0  ;;  %v1026_v18 = vpack.c.bf16 %v904_v8, %v902_v15  ;;  %v175_v58 = vpack.c.bf16 %v142_v48, %v141_v47 }
 0x12c   :  { %v352_v9 = vadd.f32 %v351_v7, %v2544_v3  ;;  %v905_v11 = vsel %vm649_vm11, %v346_v60, %v777_v2  ;;  %v778_v23 = vmul.f32 0.2, %v350_v12  ;;  %vm650_vm14 = vcmp.ge.f32.partialorder %v350_v12, 0.0 }
 0x12d   :  { %v353_v13 = vpop.f32.mrf.mxu0  ;;  %v1027_v14 = vpack.c.bf16 %v905_v11, %v903_v10  ;;  %v143_v10 = vld [vmem:[#allocation3 + $0x1f0] sm:$0xff]  ;;  %v144_v11 = vld [vmem:[#allocation3 + $0x1f8] sm:$0xff] }
 0x12e   :  { %v354_v17 = vadd.f32 %v353_v13, %v2548_v4  ;;  %v779_v20 = vmul.f32 0.2, %v352_v9  ;;  %vm651_vm13 = vcmp.ge.f32.partialorder %v352_v9, 0.0  ;;  %v906_v36 = vsel %vm650_vm14, %v350_v12, %v778_v23 }
 0x12f   :  { %v355_v19 = vpop.f32.mrf.mxu0  ;;  %1342 = vmatprep.mubr.bf16.mxu1 %v1027_v14 }
 0x130   :  { %vm652_vm12 = vcmp.ge.f32.partialorder %v354_v17, 0.0  ;;  %v780_v21 = vmul.f32 0.2, %v354_v17  ;;  %v356_v22 = vadd.f32 %v355_v19, %v2544_v3  ;;  %1343 = vmatmul.mubr.bf16.gmra.mxu1 %v1026_v18  ;;  %v907_v31 = vsel %vm651_vm13, %v352_v9, %v779_v20 }
 0x131   :  { %v359_v24 = vpop.f32.mrf.mxu0  ;;  %598 = vmatmul.mubr.bf16.gmra.mxu0 %v173_v16 }
 0x132   :  { %vm653_vm15 = vcmp.ge.f32.partialorder %v356_v22, 0.0  ;;  %v781_v25 = vmul.f32 0.2, %v356_v22  ;;  %607 = vmatprep.mubr.bf16.mxu0 %v2457_v0  ;;  %v908_v29 = vsel %vm652_vm12, %v354_v17, %v780_v21  ;;  %v360_v33 = vadd.f32 %v359_v24, %v2548_v4 }
 0x133   :  { %v361_v28 = vpop.f32.mrf.mxu0  ;;  %v1028_v39 = vpack.c.bf16 %v908_v29, %v906_v36  ;;  %v176_v21 = vpack.c.bf16 %v144_v11, %v143_v10 }
 0x134   :  { %v362_v30 = vadd.f32 %v361_v28, %v2544_v3  ;;  %v909_v32 = vsel %vm653_vm15, %v356_v22, %v781_v25  ;;  %v782_v44 = vmul.f32 0.2, %v360_v33  ;;  %vm654_vm2 = vcmp.ge.f32.partialorder %v360_v33, 0.0 }
 0x135   :  { %v363_v34 = vpop.f32.mrf.mxu0  ;;  %v1029_v35 = vpack.c.bf16 %v909_v32, %v907_v31 }
 0x136   :  { %v364_v38 = vadd.f32 %v363_v34, %v2548_v4  ;;  %v783_v41 = vmul.f32 0.2, %v362_v30  ;;  %vm655_vm1 = vcmp.ge.f32.partialorder %v362_v30, 0.0  ;;  %v910_v57 = vsel %vm654_vm2, %v360_v33, %v782_v44 }
 0x137   :  { %v365_v40 = vpop.f32.mrf.mxu0  ;;  %1352 = vmatprep.mubr.bf16.mxu1 %v1029_v35 }
 0x138   :  { %vm656_vm0 = vcmp.ge.f32.partialorder %v364_v38, 0.0  ;;  %v784_v42 = vmul.f32 0.2, %v364_v38  ;;  %v366_v43 = vadd.f32 %v365_v40, %v2544_v3  ;;  %1353 = vmatmul.mubr.bf16.gmra.mxu1 %v1028_v39  ;;  %v911_v52 = vsel %vm655_vm1, %v362_v30, %v783_v41 }
 0x139   :  { %v369_v45 = vpop.f32.mrf.mxu0  ;;  %608 = vmatmul.mubr.bf16.gmra.mxu0 %v174_v37 }
 0x13a   :  { %vm657_vm3 = vcmp.ge.f32.partialorder %v366_v43, 0.0  ;;  %v785_v46 = vmul.f32 0.2, %v366_v43  ;;  %617 = vmatprep.mubr.bf16.mxu0 %v2457_v0  ;;  %v912_v50 = vsel %vm656_vm0, %v364_v38, %v784_v42  ;;  %v370_v54 = vadd.f32 %v369_v45, %v2548_v4 }
 0x13b   :  { %v371_v49 = vpop.f32.mrf.mxu0  ;;  %v1030_v61 = vpack.c.bf16 %v912_v50, %v910_v57 }
 0x13c   :  { %v372_v51 = vadd.f32 %v371_v49, %v2544_v3  ;;  %v913_v53 = vsel %vm657_vm3, %v366_v43, %v785_v46  ;;  %v786_v7 = vmul.f32 0.2, %v370_v54  ;;  %vm658_vm6 = vcmp.ge.f32.partialorder %v370_v54, 0.0 }
 0x13d   :  { %v373_v55 = vpop.f32.mrf.mxu0  ;;  %v1031_v56 = vpack.c.bf16 %v913_v53, %v911_v52 }
 0x13e   :  { %v374_v60 = vadd.f32 %v373_v55, %v2548_v4  ;;  %v787_v2 = vmul.f32 0.2, %v372_v51  ;;  %vm659_vm5 = vcmp.ge.f32.partialorder %v372_v51, 0.0  ;;  %v914_v20 = vsel %vm658_vm6, %v370_v54, %v786_v7 }
 0x13f   :  { %v375_v1 = vpop.f32.mrf.mxu0  ;;  %1362 = vmatprep.mubr.bf16.mxu1 %v1031_v56 }
 0x140   :  { %vm660_vm4 = vcmp.ge.f32.partialorder %v374_v60, 0.0  ;;  %v788_v5 = vmul.f32 0.2, %v374_v60  ;;  %v376_v6 = vadd.f32 %v375_v1, %v2544_v3  ;;  %1363 = vmatmul.mubr.bf16.gmra.mxu1 %v1030_v61  ;;  %v915_v15 = vsel %vm659_vm5, %v372_v51, %v787_v2 }
 0x141   :  { %v379_v8 = vpop.f32.mrf.mxu0  ;;  %618 = vmatmul.mubr.bf16.gmra.mxu0 %v175_v58 }
 0x142   :  { %vm661_vm7 = vcmp.ge.f32.partialorder %v376_v6, 0.0  ;;  %v789_v9 = vmul.f32 0.2, %v376_v6  ;;  %627 = vmatprep.mubr.bf16.mxu0 %v2457_v0  ;;  %v916_v13 = vsel %vm660_vm4, %v374_v60, %v788_v5  ;;  %v380_v17 = vadd.f32 %v379_v8, %v2548_v4 }
 0x143   :  { %v381_v12 = vpop.f32.mrf.mxu0  ;;  %v1032_v23 = vpack.c.bf16 %v916_v13, %v914_v20 }
 0x144   :  { %v382_v14 = vadd.f32 %v381_v12, %v2544_v3  ;;  %v917_v16 = vsel %vm661_vm7, %v376_v6, %v789_v9  ;;  %v790_v27 = vmul.f32 0.2, %v380_v17  ;;  %vm662_vm10 = vcmp.ge.f32.partialorder %v380_v17, 0.0 }
 0x145   :  { %v383_v18 = vpop.f32.mrf.mxu0  ;;  %v1033_v19 = vpack.c.bf16 %v917_v16, %v915_v15 }
 0x146   :  { %v384_v22 = vadd.f32 %v383_v18, %v2548_v4  ;;  %v791_v0 = vmul.f32 0.2, %v382_v14  ;;  %vm663_vm9 = vcmp.ge.f32.partialorder %v382_v14, 0.0  ;;  %v918_v38 = vsel %vm662_vm10, %v380_v17, %v790_v27 }
 0x147   :  { %v385_v24 = vpop.f32.mrf.mxu0  ;;  %1372 = vmatprep.mubr.bf16.mxu1 %v1033_v19 }
 0x148   :  { %vm664_vm8 = vcmp.ge.f32.partialorder %v384_v22, 0.0  ;;  %v792_v25 = vmul.f32 0.2, %v384_v22  ;;  %v386_v26 = vadd.f32 %v385_v24, %v2544_v3  ;;  %1373 = vmatmul.mubr.bf16.gmra.mxu1 %v1032_v23  ;;  %v919_v33 = vsel %vm663_vm9, %v382_v14, %v791_v0 }
 0x149   :  { %v389_v28 = vpop.f32.mrf.mxu0  ;;  %628 = vmatmul.mubr.bf16.gmra.mxu0 %v176_v21 }
 0x14a   :  { %vm665_vm11 = vcmp.ge.f32.partialorder %v386_v26, 0.0  ;;  %v793_v29 = vmul.f32 0.2, %v386_v26  ;;  %v920_v31 = vsel %vm664_vm8, %v384_v22, %v792_v25  ;;  %v390_v35 = vadd.f32 %v389_v28, %v2548_v4 }
 0x14b   :  { %v391_v30 = vpop.f32.mrf.mxu0  ;;  %v1034_v40 = vpack.c.bf16 %v920_v31, %v918_v38 }
 0x14c   :  { %v392_v32 = vadd.f32 %v391_v30, %v2544_v3  ;;  %v921_v34 = vsel %vm665_vm11, %v386_v26, %v793_v29  ;;  %v794_v45 = vmul.f32 0.2, %v390_v35  ;;  %vm666_vm14 = vcmp.ge.f32.partialorder %v390_v35, 0.0 }
 0x14d   :  { %v393_v36 = vpop.f32.mrf.mxu0  ;;  %v1035_v37 = vpack.c.bf16 %v921_v34, %v919_v33 }
 0x14e   :  { %v394_v39 = vadd.f32 %v393_v36, %v2548_v4  ;;  %v795_v42 = vmul.f32 0.2, %v392_v32  ;;  %vm667_vm13 = vcmp.ge.f32.partialorder %v392_v32, 0.0  ;;  %v922_v56 = vsel %vm666_vm14, %v390_v35, %v794_v45 }
 0x14f   :  { %v395_v41 = vpop.f32.mrf.mxu0  ;;  %1382 = vmatprep.mubr.bf16.mxu1 %v1035_v37 }
 0x150   :  { %vm668_vm12 = vcmp.ge.f32.partialorder %v394_v39, 0.0  ;;  %v796_v43 = vmul.f32 0.2, %v394_v39  ;;  %v396_v44 = vadd.f32 %v395_v41, %v2544_v3  ;;  %1383 = vmatmul.mubr.bf16.gmra.mxu1 %v1034_v40  ;;  %v923_v51 = vsel %vm667_vm13, %v392_v32, %v795_v42 }
 0x151   :  { %v399_v46 = vpop.f32.mrf.mxu0 }
 0x152   :  { %vm669_vm15 = vcmp.ge.f32.partialorder %v396_v44, 0.0  ;;  %v797_v47 = vmul.f32 0.2, %v396_v44  ;;  %v924_v49 = vsel %vm668_vm12, %v394_v39, %v796_v43  ;;  %v400_v53 = vadd.f32 %v399_v46, %v2548_v4 }
 0x153   :  { %v401_v48 = vpop.f32.mrf.mxu0  ;;  %v1036_v58 = vpack.c.bf16 %v924_v49, %v922_v56 }
 0x154   :  { %v402_v50 = vadd.f32 %v401_v48, %v2544_v3  ;;  %v925_v52 = vsel %vm669_vm15, %v396_v44, %v797_v47  ;;  %v798_v5 = vmul.f32 0.2, %v400_v53  ;;  %vm670_vm2 = vcmp.ge.f32.partialorder %v400_v53, 0.0 }
 0x155   :  { %v403_v54 = vpop.f32.mrf.mxu0  ;;  %v1037_v55 = vpack.c.bf16 %v925_v52, %v923_v51 }
 0x156   :  { %v404_v57 = vadd.f32 %v403_v54, %v2548_v4  ;;  %v799_v61 = vmul.f32 0.2, %v402_v50  ;;  %vm671_vm1 = vcmp.ge.f32.partialorder %v402_v50, 0.0  ;;  %v926_v16 = vsel %vm670_vm2, %v400_v53, %v798_v5 }
 0x157   :  { %v405_v60 = vpop.f32.mrf.mxu0  ;;  %1392 = vmatprep.mubr.bf16.mxu1 %v1037_v55 }
 0x158   :  { %vm672_vm0 = vcmp.ge.f32.partialorder %v404_v57, 0.0  ;;  %v800_v1 = vmul.f32 0.2, %v404_v57  ;;  %v406_v2 = vadd.f32 %v405_v60, %v2544_v3  ;;  %1393 = vmatmul.mubr.bf16.gmra.mxu1 %v1036_v58  ;;  %v927_v11 = vsel %vm671_vm1, %v402_v50, %v799_v61 }
 0x159   :  { %v409_v6 = vpop.f32.mrf.mxu0 }
 0x15a   :  { %vm673_vm3 = vcmp.ge.f32.partialorder %v406_v2, 0.0  ;;  %v801_v7 = vmul.f32 0.2, %v406_v2  ;;  %v928_v9 = vsel %vm672_vm0, %v404_v57, %v800_v1  ;;  %v410_v13 = vadd.f32 %v409_v6, %v2548_v4 }
 0x15b   :  { %v411_v8 = vpop.f32.mrf.mxu0  ;;  %v1038_v18 = vpack.c.bf16 %v928_v9, %v926_v16 }
 0x15c   :  { %v412_v10 = vadd.f32 %v411_v8, %v2544_v3  ;;  %v929_v12 = vsel %vm673_vm3, %v406_v2, %v801_v7  ;;  %v802_v23 = vmul.f32 0.2, %v410_v13  ;;  %vm674_vm6 = vcmp.ge.f32.partialorder %v410_v13, 0.0 }
 0x15d   :  { %v413_v14 = vpop.f32.mrf.mxu0  ;;  %v1039_v15 = vpack.c.bf16 %v929_v12, %v927_v11 }
 0x15e   :  { %v414_v17 = vadd.f32 %v413_v14, %v2548_v4  ;;  %v803_v20 = vmul.f32 0.2, %v412_v10  ;;  %vm675_vm5 = vcmp.ge.f32.partialorder %v412_v10, 0.0  ;;  %v930_v33 = vsel %vm674_vm6, %v410_v13, %v802_v23 }
 0x15f   :  { %v415_v19 = vpop.f32.mrf.mxu0  ;;  %1402 = vmatprep.mubr.bf16.mxu1 %v1039_v15 }
 0x160   :  { %vm676_vm4 = vcmp.ge.f32.partialorder %v414_v17, 0.0  ;;  %v804_v21 = vmul.f32 0.2, %v414_v17  ;;  %v416_v22 = vadd.f32 %v415_v19, %v2544_v3  ;;  %1403 = vmatmul.mubr.bf16.gmra.mxu1 %v1038_v18  ;;  %v931_v28 = vsel %vm675_vm5, %v412_v10, %v803_v20 }
 0x161   :  { %v419_v24 = vpop.f32.mrf.mxu0 }
 0x162   :  { %vm677_vm7 = vcmp.ge.f32.partialorder %v416_v22, 0.0  ;;  %v805_v0 = vmul.f32 0.2, %v416_v22  ;;  %v932_v26 = vsel %vm676_vm4, %v414_v17, %v804_v21  ;;  %v420_v30 = vadd.f32 %v419_v24, %v2548_v4 }
 0x163   :  { %v421_v25 = vpop.f32.mrf.mxu0  ;;  %v1040_v35 = vpack.c.bf16 %v932_v26, %v930_v33 }
 0x164   :  { %v422_v27 = vadd.f32 %v421_v25, %v2544_v3  ;;  %v933_v29 = vsel %vm677_vm7, %v416_v22, %v805_v0  ;;  %v806_v40 = vmul.f32 0.2, %v420_v30  ;;  %vm678_vm10 = vcmp.ge.f32.partialorder %v420_v30, 0.0 }
 0x165   :  { %v423_v31 = vpop.f32.mrf.mxu0  ;;  %v1041_v32 = vpack.c.bf16 %v933_v29, %v931_v28 }
 0x166   :  { %v424_v34 = vadd.f32 %v423_v31, %v2548_v4  ;;  %v807_v37 = vmul.f32 0.2, %v422_v27  ;;  %vm679_vm9 = vcmp.ge.f32.partialorder %v422_v27, 0.0  ;;  %v934_v51 = vsel %vm678_vm10, %v420_v30, %v806_v40 }
 0x167   :  { %v425_v36 = vpop.f32.mrf.mxu0  ;;  %1412 = vmatprep.mubr.bf16.mxu1 %v1041_v32 }
 0x168   :  { %vm680_vm8 = vcmp.ge.f32.partialorder %v424_v34, 0.0  ;;  %v808_v38 = vmul.f32 0.2, %v424_v34  ;;  %v426_v39 = vadd.f32 %v425_v36, %v2544_v3  ;;  %1413 = vmatmul.mubr.bf16.gmra.mxu1 %v1040_v35  ;;  %v935_v46 = vsel %vm679_vm9, %v422_v27, %v807_v37 }
 0x169   :  { %v429_v41 = vpop.f32.mrf.mxu0 }
 0x16a   :  { %vm681_vm11 = vcmp.ge.f32.partialorder %v426_v39, 0.0  ;;  %v809_v42 = vmul.f32 0.2, %v426_v39  ;;  %v936_v44 = vsel %vm680_vm8, %v424_v34, %v808_v38  ;;  %v430_v48 = vadd.f32 %v429_v41, %v2548_v4 }
 0x16b   :  { %v431_v43 = vpop.f32.mrf.mxu0  ;;  %v1042_v53 = vpack.c.bf16 %v936_v44, %v934_v51 }
 0x16c   :  { %v432_v45 = vadd.f32 %v431_v43, %v2544_v3  ;;  %v937_v47 = vsel %vm681_vm11, %v426_v39, %v809_v42  ;;  %v810_v58 = vmul.f32 0.2, %v430_v48  ;;  %vm682_vm14 = vcmp.ge.f32.partialorder %v430_v48, 0.0 }
 0x16d   :  { %v433_v49 = vpop.f32.mrf.mxu0  ;;  %v1043_v50 = vpack.c.bf16 %v937_v47, %v935_v46 }
 0x16e   :  { %v434_v52 = vadd.f32 %v433_v49, %v2548_v4  ;;  %v811_v55 = vmul.f32 0.2, %v432_v45  ;;  %vm683_vm13 = vcmp.ge.f32.partialorder %v432_v45, 0.0  ;;  %v938_v11 = vsel %vm682_vm14, %v430_v48, %v810_v58 }
 0x16f   :  { %v435_v54 = vpop.f32.mrf.mxu0  ;;  %1422 = vmatprep.mubr.bf16.mxu1 %v1043_v50 }
 0x170   :  { %vm684_vm12 = vcmp.ge.f32.partialorder %v434_v52, 0.0  ;;  %v812_v56 = vmul.f32 0.2, %v434_v52  ;;  %v436_v57 = vadd.f32 %v435_v54, %v2544_v3  ;;  %1423 = vmatmul.mubr.bf16.gmra.mxu1 %v1042_v53  ;;  %v939_v6 = vsel %vm683_vm13, %v432_v45, %v811_v55 }
 0x171   :  { %v439_v60 = vpop.f32.mrf.mxu0 }
 0x172   :  { %vm685_vm15 = vcmp.ge.f32.partialorder %v436_v57, 0.0  ;;  %v813_v61 = vmul.f32 0.2, %v436_v57  ;;  %v940_v2 = vsel %vm684_vm12, %v434_v52, %v812_v56  ;;  %v440_v8 = vadd.f32 %v439_v60, %v2548_v4 }
 0x173   :  { %v441_v1 = vpop.f32.mrf.mxu0  ;;  %v1044_v13 = vpack.c.bf16 %v940_v2, %v938_v11 }
 0x174   :  { %v442_v5 = vadd.f32 %v441_v1, %v2544_v3  ;;  %v941_v7 = vsel %vm685_vm15, %v436_v57, %v813_v61  ;;  %v814_v18 = vmul.f32 0.2, %v440_v8  ;;  %vm686_vm2 = vcmp.ge.f32.partialorder %v440_v8, 0.0 }
 0x175   :  { %v443_v9 = vpop.f32.mrf.mxu0  ;;  %v1045_v10 = vpack.c.bf16 %v941_v7, %v939_v6 }
 0x176   :  { %v444_v12 = vadd.f32 %v443_v9, %v2548_v4  ;;  %v815_v15 = vmul.f32 0.2, %v442_v5  ;;  %vm687_vm1 = vcmp.ge.f32.partialorder %v442_v5, 0.0  ;;  %v942_v28 = vsel %vm686_vm2, %v440_v8, %v814_v18 }
 0x177   :  { %v445_v14 = vpop.f32.mrf.mxu0  ;;  %1432 = vmatprep.mubr.bf16.mxu1 %v1045_v10 }
 0x178   :  { %vm688_vm0 = vcmp.ge.f32.partialorder %v444_v12, 0.0  ;;  %v816_v16 = vmul.f32 0.2, %v444_v12  ;;  %v446_v17 = vadd.f32 %v445_v14, %v2544_v3  ;;  %1433 = vmatmul.mubr.bf16.gmra.mxu1 %v1044_v13  ;;  %v943_v24 = vsel %vm687_vm1, %v442_v5, %v815_v15 }
 0x179   :  { %v449_v19 = vpop.f32.mrf.mxu0 }
 0x17a   :  { %vm689_vm3 = vcmp.ge.f32.partialorder %v446_v17, 0.0  ;;  %v817_v20 = vmul.f32 0.2, %v446_v17  ;;  %v944_v22 = vsel %vm688_vm0, %v444_v12, %v816_v16  ;;  %v450_v25 = vadd.f32 %v449_v19, %v2548_v4 }
 0x17b   :  { %v451_v21 = vpop.f32.mrf.mxu0  ;;  %v1046_v30 = vpack.c.bf16 %v944_v22, %v942_v28 }
 0x17c   :  { %v452_v23 = vadd.f32 %v451_v21, %v2544_v3  ;;  %v945_v0 = vsel %vm689_vm3, %v446_v17, %v817_v20  ;;  %v818_v35 = vmul.f32 0.2, %v450_v25  ;;  %vm690_vm6 = vcmp.ge.f32.partialorder %v450_v25, 0.0 }
 0x17d   :  { %v453_v26 = vpop.f32.mrf.mxu0  ;;  %v1047_v27 = vpack.c.bf16 %v945_v0, %v943_v24 }
 0x17e   :  { %v454_v29 = vadd.f32 %v453_v26, %v2548_v4  ;;  %v819_v32 = vmul.f32 0.2, %v452_v23  ;;  %vm691_vm5 = vcmp.ge.f32.partialorder %v452_v23, 0.0  ;;  %v946_v46 = vsel %vm690_vm6, %v450_v25, %v818_v35 }
 0x17f   :  { %v455_v31 = vpop.f32.mrf.mxu0  ;;  %1442 = vmatprep.mubr.bf16.mxu1 %v1047_v27 }
 0x180   :  { %vm692_vm4 = vcmp.ge.f32.partialorder %v454_v29, 0.0  ;;  %v820_v33 = vmul.f32 0.2, %v454_v29  ;;  %v456_v34 = vadd.f32 %v455_v31, %v2544_v3  ;;  %1443 = vmatmul.mubr.bf16.gmra.mxu1 %v1046_v30  ;;  %v947_v41 = vsel %vm691_vm5, %v452_v23, %v819_v32 }
 0x181   :  { %v459_v36 = vpop.f32.mrf.mxu0 }
 0x182   :  { %vm693_vm7 = vcmp.ge.f32.partialorder %v456_v34, 0.0  ;;  %v821_v37 = vmul.f32 0.2, %v456_v34  ;;  %v948_v39 = vsel %vm692_vm4, %v454_v29, %v820_v33  ;;  %v460_v43 = vadd.f32 %v459_v36, %v2548_v4 }
 0x183   :  { %v461_v38 = vpop.f32.mrf.mxu0  ;;  %v1048_v48 = vpack.c.bf16 %v948_v39, %v946_v46 }
 0x184   :  { %v462_v40 = vadd.f32 %v461_v38, %v2544_v3  ;;  %v949_v42 = vsel %vm693_vm7, %v456_v34, %v821_v37  ;;  %v822_v53 = vmul.f32 0.2, %v460_v43  ;;  %vm694_vm10 = vcmp.ge.f32.partialorder %v460_v43, 0.0 }
 0x185   :  { %v463_v44 = vpop.f32.mrf.mxu0  ;;  %v1049_v45 = vpack.c.bf16 %v949_v42, %v947_v41 }
 0x186   :  { %v464_v47 = vadd.f32 %v463_v44, %v2548_v4  ;;  %v823_v50 = vmul.f32 0.2, %v462_v40  ;;  %vm695_vm9 = vcmp.ge.f32.partialorder %v462_v40, 0.0  ;;  %v950_v6 = vsel %vm694_vm10, %v460_v43, %v822_v53 }
 0x187   :  { %v465_v49 = vpop.f32.mrf.mxu0  ;;  %1452 = vmatprep.mubr.bf16.mxu1 %v1049_v45 }
 0x188   :  { %vm696_vm8 = vcmp.ge.f32.partialorder %v464_v47, 0.0  ;;  %v824_v51 = vmul.f32 0.2, %v464_v47  ;;  %v466_v52 = vadd.f32 %v465_v49, %v2544_v3  ;;  %1453 = vmatmul.mubr.bf16.gmra.mxu1 %v1048_v48  ;;  %v951_v60 = vsel %vm695_vm9, %v462_v40, %v823_v50 }
 0x189   :  { %v469_v54 = vpop.f32.mrf.mxu0 }
 0x18a   :  { %vm697_vm11 = vcmp.ge.f32.partialorder %v466_v52, 0.0  ;;  %v825_v55 = vmul.f32 0.2, %v466_v52  ;;  %v952_v57 = vsel %vm696_vm8, %v464_v47, %v824_v51  ;;  %v470_v1 = vadd.f32 %v469_v54, %v2548_v4 }
 0x18b   :  { %v471_v56 = vpop.f32.mrf.mxu0  ;;  %v1050_v8 = vpack.c.bf16 %v952_v57, %v950_v6 }
 0x18c   :  { %v472_v58 = vadd.f32 %v471_v56, %v2544_v3  ;;  %v953_v61 = vsel %vm697_vm11, %v466_v52, %v825_v55  ;;  %v826_v13 = vmul.f32 0.2, %v470_v1  ;;  %vm698_vm14 = vcmp.ge.f32.partialorder %v470_v1, 0.0 }
 0x18d   :  { %v473_v2 = vpop.f32.mrf.mxu0  ;;  %v1051_v5 = vpack.c.bf16 %v953_v61, %v951_v60 }
 0x18e   :  { %v474_v7 = vadd.f32 %v473_v2, %v2548_v4  ;;  %v827_v10 = vmul.f32 0.2, %v472_v58  ;;  %vm699_vm13 = vcmp.ge.f32.partialorder %v472_v58, 0.0  ;;  %v954_v24 = vsel %vm698_vm14, %v470_v1, %v826_v13 }
 0x18f   :  { %v475_v9 = vpop.f32.mrf.mxu0  ;;  %1462 = vmatprep.mubr.bf16.mxu1 %v1051_v5 }
 0x190   :  { %vm700_vm12 = vcmp.ge.f32.partialorder %v474_v7, 0.0  ;;  %v828_v11 = vmul.f32 0.2, %v474_v7  ;;  %v476_v12 = vadd.f32 %v475_v9, %v2544_v3  ;;  %1463 = vmatmul.mubr.bf16.gmra.mxu1 %v1050_v8  ;;  %v955_v19 = vsel %vm699_vm13, %v472_v58, %v827_v10 }
 0x191   :  { %v479_v14 = vpop.f32.mrf.mxu0 }
 0x192   :  { %vm701_vm15 = vcmp.ge.f32.partialorder %v476_v12, 0.0  ;;  %v829_v15 = vmul.f32 0.2, %v476_v12  ;;  %v956_v17 = vsel %vm700_vm12, %v474_v7, %v828_v11  ;;  %v480_v21 = vadd.f32 %v479_v14, %v2548_v4 }
 0x193   :  { %v481_v16 = vpop.f32.mrf.mxu0  ;;  %v1052_v25 = vpack.c.bf16 %v956_v17, %v954_v24 }
 0x194   :  { %v482_v18 = vadd.f32 %v481_v16, %v2544_v3  ;;  %v957_v20 = vsel %vm701_vm15, %v476_v12, %v829_v15  ;;  %v830_v30 = vmul.f32 0.2, %v480_v21  ;;  %vm702_vm2 = vcmp.ge.f32.partialorder %v480_v21, 0.0 }
 0x195   :  { %v483_v22 = vpop.f32.mrf.mxu0  ;;  %v1053_v23 = vpack.c.bf16 %v957_v20, %v955_v19 }
 0x196   :  { %v484_v0 = vadd.f32 %v483_v22, %v2548_v4  ;;  %v831_v27 = vmul.f32 0.2, %v482_v18  ;;  %vm703_vm1 = vcmp.ge.f32.partialorder %v482_v18, 0.0  ;;  %v958_v41 = vsel %vm702_vm2, %v480_v21, %v830_v30 }
 0x197   :  { %v485_v26 = vpop.f32.mrf.mxu0  ;;  %1472 = vmatprep.mubr.bf16.mxu1 %v1053_v23 }
 0x198   :  { %vm704_vm0 = vcmp.ge.f32.partialorder %v484_v0, 0.0  ;;  %v832_v28 = vmul.f32 0.2, %v484_v0  ;;  %v486_v29 = vadd.f32 %v485_v26, %v2544_v3  ;;  %1473 = vmatmul.mubr.bf16.gmra.mxu1 %v1052_v25  ;;  %v959_v36 = vsel %vm703_vm1, %v482_v18, %v831_v27 }
 0x199   :  { %v489_v31 = vpop.f32.mrf.mxu0 }
 0x19a   :  { %vm705_vm3 = vcmp.ge.f32.partialorder %v486_v29, 0.0  ;;  %v833_v32 = vmul.f32 0.2, %v486_v29  ;;  %v960_v34 = vsel %vm704_vm0, %v484_v0, %v832_v28  ;;  %v490_v38 = vadd.f32 %v489_v31, %v2548_v4 }
 0x19b   :  { %v491_v33 = vpop.f32.mrf.mxu0  ;;  %v1054_v43 = vpack.c.bf16 %v960_v34, %v958_v41 }
 0x19c   :  { %v492_v35 = vadd.f32 %v491_v33, %v2544_v3  ;;  %v961_v37 = vsel %vm705_vm3, %v486_v29, %v833_v32  ;;  %v834_v48 = vmul.f32 0.2, %v490_v38  ;;  %vm706_vm6 = vcmp.ge.f32.partialorder %v490_v38, 0.0 }
 0x19d   :  { %v493_v39 = vpop.f32.mrf.mxu0  ;;  %v1055_v40 = vpack.c.bf16 %v961_v37, %v959_v36 }
 0x19e   :  { %v494_v42 = vadd.f32 %v493_v39, %v2548_v4  ;;  %v835_v45 = vmul.f32 0.2, %v492_v35  ;;  %vm707_vm5 = vcmp.ge.f32.partialorder %v492_v35, 0.0  ;;  %v962_v60 = vsel %vm706_vm6, %v490_v38, %v834_v48 }
 0x19f   :  { %v495_v44 = vpop.f32.mrf.mxu0  ;;  %1482 = vmatprep.mubr.bf16.mxu1 %v1055_v40 }
 0x1a0   :  { %vm708_vm4 = vcmp.ge.f32.partialorder %v494_v42, 0.0  ;;  %v836_v46 = vmul.f32 0.2, %v494_v42  ;;  %v496_v47 = vadd.f32 %v495_v44, %v2544_v3  ;;  %1483 = vmatmul.mubr.bf16.gmra.mxu1 %v1054_v43  ;;  %v963_v54 = vsel %vm707_vm5, %v492_v35, %v835_v45 }
 0x1a1   :  { %v499_v49 = vpop.f32.mrf.mxu0 }
 0x1a2   :  { %vm709_vm7 = vcmp.ge.f32.partialorder %v496_v47, 0.0  ;;  %v837_v50 = vmul.f32 0.2, %v496_v47  ;;  %v964_v52 = vsel %vm708_vm4, %v494_v42, %v836_v46  ;;  %v500_v56 = vadd.f32 %v499_v49, %v2548_v4 }
 0x1a3   :  { %v501_v51 = vpop.f32.mrf.mxu0  ;;  %v1056_v1 = vpack.c.bf16 %v964_v52, %v962_v60 }
 0x1a4   :  { %v502_v53 = vadd.f32 %v501_v51, %v2544_v3  ;;  %v965_v55 = vsel %vm709_vm7, %v496_v47, %v837_v50  ;;  %v838_v8 = vmul.f32 0.2, %v500_v56  ;;  %vm710_vm10 = vcmp.ge.f32.partialorder %v500_v56, 0.0 }
 0x1a5   :  { %v503_v57 = vpop.f32.mrf.mxu0  ;;  %v1057_v58 = vpack.c.bf16 %v965_v55, %v963_v54 }
 0x1a6   :  { %v504_v61 = vadd.f32 %v503_v57, %v2548_v4  ;;  %v839_v5 = vmul.f32 0.2, %v502_v53  ;;  %vm711_vm9 = vcmp.ge.f32.partialorder %v502_v53, 0.0  ;;  %v966_v19 = vsel %vm710_vm10, %v500_v56, %v838_v8 }
 0x1a7   :  { %v505_v2 = vpop.f32.mrf.mxu0  ;;  %1492 = vmatprep.mubr.bf16.mxu1 %v1057_v58 }
 0x1a8   :  { %vm712_vm8 = vcmp.ge.f32.partialorder %v504_v61, 0.0  ;;  %v840_v6 = vmul.f32 0.2, %v504_v61  ;;  %v506_v7 = vadd.f32 %v505_v2, %v2544_v3  ;;  %1493 = vmatmul.mubr.bf16.gmra.mxu1 %v1056_v1  ;;  %v967_v14 = vsel %vm711_vm9, %v502_v53, %v839_v5 }
 0x1a9   :  { %v509_v9 = vpop.f32.mrf.mxu0 }
 0x1aa   :  { %vm713_vm11 = vcmp.ge.f32.partialorder %v506_v7, 0.0  ;;  %v841_v10 = vmul.f32 0.2, %v506_v7  ;;  %v968_v12 = vsel %vm712_vm8, %v504_v61, %v840_v6  ;;  %v510_v16 = vadd.f32 %v509_v9, %v2548_v4 }
 0x1ab   :  { %v511_v11 = vpop.f32.mrf.mxu0  ;;  %v1058_v21 = vpack.c.bf16 %v968_v12, %v966_v19 }
 0x1ac   :  { %v512_v13 = vadd.f32 %v511_v11, %v2544_v3  ;;  %v969_v15 = vsel %vm713_vm11, %v506_v7, %v841_v10  ;;  %v842_v25 = vmul.f32 0.2, %v510_v16  ;;  %vm714_vm14 = vcmp.ge.f32.partialorder %v510_v16, 0.0 }
 0x1ad   :  { %v513_v17 = vpop.f32.mrf.mxu0  ;;  %v1059_v18 = vpack.c.bf16 %v969_v15, %v967_v14 }
 0x1ae   :  { %v514_v20 = vadd.f32 %v513_v17, %v2548_v4  ;;  %v843_v23 = vmul.f32 0.2, %v512_v13  ;;  %vm715_vm13 = vcmp.ge.f32.partialorder %v512_v13, 0.0  ;;  %v970_v36 = vsel %vm714_vm14, %v510_v16, %v842_v25 }
 0x1af   :  { %v515_v22 = vpop.f32.mrf.mxu0  ;;  %1502 = vmatprep.mubr.bf16.mxu1 %v1059_v18 }
 0x1b0   :  { %vm716_vm12 = vcmp.ge.f32.partialorder %v514_v20, 0.0  ;;  %v844_v24 = vmul.f32 0.2, %v514_v20  ;;  %v516_v0 = vadd.f32 %v515_v22, %v2544_v3  ;;  %1503 = vmatmul.mubr.bf16.gmra.mxu1 %v1058_v21  ;;  %v971_v31 = vsel %vm715_vm13, %v512_v13, %v843_v23 }
 0x1b1   :  { %v519_v26 = vpop.f32.mrf.mxu0 }
 0x1b2   :  { %vm717_vm15 = vcmp.ge.f32.partialorder %v516_v0, 0.0  ;;  %v845_v27 = vmul.f32 0.2, %v516_v0  ;;  %v972_v29 = vsel %vm716_vm12, %v514_v20, %v844_v24  ;;  %v520_v33 = vadd.f32 %v519_v26, %v2548_v4 }
 0x1b3   :  { %v521_v28 = vpop.f32.mrf.mxu0  ;;  %v1060_v38 = vpack.c.bf16 %v972_v29, %v970_v36 }
 0x1b4   :  { %v522_v30 = vadd.f32 %v521_v28, %v2544_v3  ;;  %v973_v32 = vsel %vm717_vm15, %v516_v0, %v845_v27  ;;  %v846_v43 = vmul.f32 0.2, %v520_v33  ;;  %vm718_vm2 = vcmp.ge.f32.partialorder %v520_v33, 0.0 }
 0x1b5   :  { %v523_v34 = vpop.f32.mrf.mxu0  ;;  %v1061_v35 = vpack.c.bf16 %v973_v32, %v971_v31 }
 0x1b6   :  { %v524_v37 = vadd.f32 %v523_v34, %v2548_v4  ;;  %v847_v40 = vmul.f32 0.2, %v522_v30  ;;  %vm719_vm1 = vcmp.ge.f32.partialorder %v522_v30, 0.0  ;;  %v974_v54 = vsel %vm718_vm2, %v520_v33, %v846_v43 }
 0x1b7   :  { %v525_v39 = vpop.f32.mrf.mxu0  ;;  %1512 = vmatprep.mubr.bf16.mxu1 %v1061_v35 }
 0x1b8   :  { %vm720_vm0 = vcmp.ge.f32.partialorder %v524_v37, 0.0  ;;  %v848_v41 = vmul.f32 0.2, %v524_v37  ;;  %v526_v42 = vadd.f32 %v525_v39, %v2544_v3  ;;  %1513 = vmatmul.mubr.bf16.gmra.mxu1 %v1060_v38  ;;  %v975_v49 = vsel %vm719_vm1, %v522_v30, %v847_v40 }
 0x1b9   :  { %v529_v44 = vpop.f32.mrf.mxu0 }
 0x1ba   :  { %vm721_vm3 = vcmp.ge.f32.partialorder %v526_v42, 0.0  ;;  %v849_v45 = vmul.f32 0.2, %v526_v42  ;;  %v976_v47 = vsel %vm720_vm0, %v524_v37, %v848_v41  ;;  %v530_v51 = vadd.f32 %v529_v44, %v2548_v4 }
 0x1bb   :  { %v531_v46 = vpop.f32.mrf.mxu0  ;;  %v1062_v56 = vpack.c.bf16 %v976_v47, %v974_v54 }
 0x1bc   :  { %v532_v48 = vadd.f32 %v531_v46, %v2544_v3  ;;  %v977_v50 = vsel %vm721_vm3, %v526_v42, %v849_v45  ;;  %v850_v1 = vmul.f32 0.2, %v530_v51  ;;  %vm722_vm6 = vcmp.ge.f32.partialorder %v530_v51, 0.0 }
 0x1bd   :  { %v533_v52 = vpop.f32.mrf.mxu0  ;;  %v1063_v53 = vpack.c.bf16 %v977_v50, %v975_v49 }
 0x1be   :  { %v534_v55 = vadd.f32 %v533_v52, %v2548_v4  ;;  %v851_v58 = vmul.f32 0.2, %v532_v48  ;;  %vm723_vm5 = vcmp.ge.f32.partialorder %v532_v48, 0.0  ;;  %v978_v14 = vsel %vm722_vm6, %v530_v51, %v850_v1 }
 0x1bf   :  { %v535_v57 = vpop.f32.mrf.mxu0  ;;  %1522 = vmatprep.mubr.bf16.mxu1 %v1063_v53 }
 0x1c0   :  { %vm724_vm4 = vcmp.ge.f32.partialorder %v534_v55, 0.0  ;;  %v852_v60 = vmul.f32 0.2, %v534_v55  ;;  %v536_v61 = vadd.f32 %v535_v57, %v2544_v3  ;;  %1523 = vmatmul.mubr.bf16.gmra.mxu1 %v1062_v56  ;;  %v979_v9 = vsel %vm723_vm5, %v532_v48, %v851_v58 }
 0x1c1   :  { %v539_v2 = vpop.f32.mrf.mxu0 }
 0x1c2   :  { %vm725_vm7 = vcmp.ge.f32.partialorder %v536_v61, 0.0  ;;  %v853_v5 = vmul.f32 0.2, %v536_v61  ;;  %v980_v7 = vsel %vm724_vm4, %v534_v55, %v852_v60  ;;  %v540_v11 = vadd.f32 %v539_v2, %v2548_v4  ;;  %v2657_v60 = vld [vmem:[#allocation8] sm:$0x3] }
 0x1c3   :  { %v541_v6 = vpop.f32.mrf.mxu0  ;;  %v1064_v16 = vpack.c.bf16 %v980_v7, %v978_v14 }
 0x1c4   :  { %v542_v8 = vadd.f32 %v541_v6, %v2544_v3  ;;  %v981_v10 = vsel %vm725_vm7, %v536_v61, %v853_v5  ;;  %v854_v21 = vmul.f32 0.2, %v540_v11  ;;  %vm726_vm10 = vcmp.ge.f32.partialorder %v540_v11, 0.0 }
 0x1c5   :  { %v543_v12 = vpop.f32.mrf.mxu0  ;;  %v1065_v13 = vpack.c.bf16 %v981_v10, %v979_v9  ;;  %v2663_v9 = vrot.slane %v2657_v60, %v197_v63 }
 0x1c6   :  { %v544_v15 = vadd.f32 %v543_v12, %v2548_v4  ;;  %v855_v18 = vmul.f32 0.2, %v542_v8  ;;  %vm727_vm9 = vcmp.ge.f32.partialorder %v542_v8, 0.0  ;;  %v982_v31 = vsel %vm726_vm10, %v540_v11, %v854_v21 }
 0x1c7   :  { %v545_v17 = vpop.f32.mrf.mxu0  ;;  %1532 = vmatprep.mubr.bf16.mxu1 %v1065_v13 }
 0x1c8   :  { %vm728_vm8 = vcmp.ge.f32.partialorder %v544_v15, 0.0  ;;  %v856_v19 = vmul.f32 0.2, %v544_v15  ;;  %v546_v20 = vadd.f32 %v545_v17, %v2544_v3  ;;  %1533 = vmatmul.mubr.bf16.gmra.mxu1 %v1064_v16  ;;  %v983_v26 = vsel %vm727_vm9, %v542_v8, %v855_v18 }
 0x1c9   :  { %v549_v22 = vpop.f32.mrf.mxu0 }
 0x1ca   :  { %vm729_vm11 = vcmp.ge.f32.partialorder %v546_v20, 0.0  ;;  %v857_v23 = vmul.f32 0.2, %v546_v20  ;;  %v984_v0 = vsel %vm728_vm8, %v544_v15, %v856_v19  ;;  %v550_v28 = vadd.f32 %v549_v22, %v2548_v4 }
 0x1cb   :  { %v551_v24 = vpop.f32.mrf.mxu0  ;;  %v1066_v33 = vpack.c.bf16 %v984_v0, %v982_v31 }
 0x1cc   :  { %v552_v25 = vadd.f32 %v551_v24, %v2544_v3  ;;  %v985_v27 = vsel %vm729_vm11, %v546_v20, %v857_v23  ;;  %v858_v38 = vmul.f32 0.2, %v550_v28  ;;  %vm730_vm14 = vcmp.ge.f32.partialorder %v550_v28, 0.0 }
 0x1cd   :  { %v553_v29 = vpop.f32.mrf.mxu0  ;;  %v1067_v30 = vpack.c.bf16 %v985_v27, %v983_v26 }
 0x1ce   :  { %v554_v32 = vadd.f32 %v553_v29, %v2548_v4  ;;  %v859_v35 = vmul.f32 0.2, %v552_v25  ;;  %vm731_vm13 = vcmp.ge.f32.partialorder %v552_v25, 0.0  ;;  %v986_v49 = vsel %vm730_vm14, %v550_v28, %v858_v38 }
 0x1cf   :  { %v555_v34 = vpop.f32.mrf.mxu0  ;;  %1542 = vmatprep.mubr.bf16.mxu1 %v1067_v30 }
 0x1d0   :  { %vm732_vm12 = vcmp.ge.f32.partialorder %v554_v32, 0.0  ;;  %v860_v36 = vmul.f32 0.2, %v554_v32  ;;  %v556_v37 = vadd.f32 %v555_v34, %v2544_v3  ;;  %1543 = vmatmul.mubr.bf16.gmra.mxu1 %v1066_v33  ;;  %v987_v44 = vsel %vm731_vm13, %v552_v25, %v859_v35 }
 0x1d1   :  { %v559_v39 = vpop.f32.mrf.mxu0 }
 0x1d2   :  { %vm733_vm15 = vcmp.ge.f32.partialorder %v556_v37, 0.0  ;;  %v861_v40 = vmul.f32 0.2, %v556_v37  ;;  %v988_v42 = vsel %vm732_vm12, %v554_v32, %v860_v36  ;;  %v560_v46 = vadd.f32 %v559_v39, %v2548_v4 }
 0x1d3   :  { %v561_v41 = vpop.f32.mrf.mxu0  ;;  %v1068_v51 = vpack.c.bf16 %v988_v42, %v986_v49 }
 0x1d4   :  { %v562_v43 = vadd.f32 %v561_v41, %v2544_v3  ;;  %v989_v45 = vsel %vm733_vm15, %v556_v37, %v861_v40  ;;  %v862_v56 = vmul.f32 0.2, %v560_v46  ;;  %vm734_vm2 = vcmp.ge.f32.partialorder %v560_v46, 0.0 }
 0x1d5   :  { %v563_v47 = vpop.f32.mrf.mxu0  ;;  %v1069_v48 = vpack.c.bf16 %v989_v45, %v987_v44 }
 0x1d6   :  { %v564_v50 = vadd.f32 %v563_v47, %v2548_v4  ;;  %v863_v53 = vmul.f32 0.2, %v562_v43  ;;  %vm735_vm1 = vcmp.ge.f32.partialorder %v562_v43, 0.0  ;;  %v990_v10 = vsel %vm734_vm2, %v560_v46, %v862_v56 }
 0x1d7   :  { %v565_v52 = vpop.f32.mrf.mxu0  ;;  %1552 = vmatprep.mubr.bf16.mxu1 %v1069_v48 }
 0x1d8   :  { %vm736_vm0 = vcmp.ge.f32.partialorder %v564_v50, 0.0  ;;  %v864_v54 = vmul.f32 0.2, %v564_v50  ;;  %v566_v55 = vadd.f32 %v565_v52, %v2544_v3  ;;  %1553 = vmatmul.mubr.bf16.gmra.mxu1 %v1068_v51  ;;  %v991_v2 = vsel %vm735_vm1, %v562_v43, %v863_v53 }
 0x1d9   :  { %v569_v57 = vpop.f32.mrf.mxu0 }
 0x1da   :  { %vm737_vm3 = vcmp.ge.f32.partialorder %v566_v55, 0.0  ;;  %v865_v58 = vmul.f32 0.2, %v566_v55  ;;  %v992_v1 = vsel %vm736_vm0, %v564_v50, %v864_v54  ;;  %v570_v11 = vadd.f32 %v569_v57, %v2548_v4 }
 0x1db   :  { %v571_v61 = vpop.f32.mrf.mxu0  ;;  %v1070_v13 = vpack.c.bf16 %v992_v1, %v990_v10 }
 0x1dc   :  { %v993_v5 = vsel %vm737_vm3, %v566_v55, %v865_v58  ;;  %v572_v6 = vadd.f32 %v571_v61, %v2544_v3  ;;  %v866_v63 = vmul.f32 0.2, %v570_v11  ;;  %vm738_vm7 = vcmp.ge.f32.partialorder %v570_v11, 0.0 }
 0x1dd   :  { %v573_v7 = vpop.f32.mrf.mxu0  ;;  %v1071_v8 = vpack.c.bf16 %v993_v5, %v991_v2 }
 0x1de   :  { %v574_v12 = vadd.f32 %v573_v7, %v2548_v4  ;;  %v867_v18 = vmul.f32 0.2, %v572_v6  ;;  %vm739_vm5 = vcmp.ge.f32.partialorder %v572_v6, 0.0  ;;  %v994_v35 = vsel %vm738_vm7, %v570_v11, %v866_v63 }
 0x1df   :  { %v575_v14 = vpop.f32.mrf.mxu0  ;;  %1562 = vmatprep.mubr.bf16.mxu1 %v1071_v8 }
 0x1e0   :  { %v868_v15 = vmul.f32 0.2, %v574_v12  ;;  %v576_v16 = vadd.f32 %v575_v14, %v2544_v3  ;;  %v1324_v17 = vpop.f32.mrf.mxu1  ;;  %1563 = vmatmul.mubr.bf16.gmra.mxu1 %v1070_v13  ;;  %vm740_vm4 = vcmp.ge.f32.partialorder %v574_v12, 0.0  ;;  %v995_v31 = vsel %vm739_vm5, %v572_v6, %v867_v18 }
 0x1e1   :  { %v1325_v19 = vadd.f32 %v1324_v17, %v2663_v9  ;;  %v579_v20 = vpop.f32.mrf.mxu0 }
 0x1e2   :  { %vm741_vm6 = vcmp.ge.f32.partialorder %v576_v16, 0.0  ;;  %v869_v21 = vmul.f32 0.2, %v576_v16  ;;  %v2669_v22 = vpop.f32.mrf.mxu1  ;;  %v580_v0 = vadd.f32 %v579_v20, %v2548_v4  ;;  %v996_v27 = vsel %vm740_vm4, %v574_v12, %v868_v15 }
 0x1e3   :  { %v581_v23 = vpop.f32.mrf.mxu0  ;;  %v1771_v24 = vmul.f32 0.2, %v1325_v19  ;;  %vm1643_vm8 = vcmp.ge.f32.partialorder %v1325_v19, 0.0  ;;  %v1072_v38 = vpack.c.bf16 %v996_v27, %v994_v35 }
 0x1e4   :  { %v1328_v25 = vpop.f32.mrf.mxu1  ;;  %v997_v26 = vsel %vm741_vm6, %v576_v16, %v869_v21  ;;  %v582_v28 = vadd.f32 %v581_v23, %v2544_v3  ;;  %v870_v40 = vmul.f32 0.2, %v580_v0  ;;  %vm742_vm13 = vcmp.ge.f32.partialorder %v580_v0, 0.0 }
 0x1e5   :  { %v1329_v29 = vadd.f32 %v1328_v25, %v2663_v9  ;;  %v583_v30 = vpop.f32.mrf.mxu0  ;;  %v1073_v34 = vpack.c.bf16 %v997_v26, %v995_v31  ;;  %v2677_v39 = vsel %vm1643_vm8, %v1325_v19, %v1771_v24 }
 0x1e6   :  { %v584_v32 = vadd.f32 %v583_v30, %v2548_v4  ;;  %v2675_v33 = vpop.f32.mrf.mxu1  ;;  %v871_v44 = vmul.f32 0.2, %v582_v28  ;;  %vm743_vm11 = vcmp.ge.f32.partialorder %v582_v28, 0.0  ;;  %v998_v5 = vsel %vm742_vm13, %v580_v0, %v870_v40 }
 0x1e7   :  { %vm1645_vm9 = vcmp.ge.f32.partialorder %v1329_v29, 0.0  ;;  %v1773_v36 = vmul.f32 0.2, %v1329_v29  ;;  %v585_v37 = vpop.f32.mrf.mxu0  ;;  %1572 = vmatprep.mubr.bf16.mxu1 %v1073_v34 }
 0x1e8   :  { %v872_v41 = vmul.f32 0.2, %v584_v32  ;;  %v586_v42 = vadd.f32 %v585_v37, %v2544_v3  ;;  %v1334_v43 = vpop.f32.mrf.mxu1  ;;  %vm744_vm10 = vcmp.ge.f32.partialorder %v584_v32, 0.0  ;;  %1573 = vmatmul.mubr.bf16.gmra.mxu1 %v1072_v38  ;;  %v999_v58 = vsel %vm743_vm11, %v582_v28, %v871_v44 }
 0x1e9   :  { %v2680_v45 = vsel %vm1645_vm9, %v1329_v29, %v1773_v36  ;;  %v1335_v46 = vadd.f32 %v1334_v43, %v2663_v9  ;;  %v589_v47 = vpop.f32.mrf.mxu0 }
 0x1ea   :  { %v2028_v48 = vpack.c.bf16 %v2680_v45, %v2677_v39  ;;  %vm745_vm12 = vcmp.ge.f32.partialorder %v586_v42, 0.0  ;;  %v873_v49 = vmul.f32 0.2, %v586_v42  ;;  %v2685_v50 = vpop.f32.mrf.mxu1  ;;  %v1000_v54 = vsel %vm744_vm10, %v584_v32, %v872_v41 }
 0x1eb   :  { %v591_v51 = vpop.f32.mrf.mxu0  ;;  %v1775_v55 = vmul.f32 0.2, %v1335_v46  ;;  %vm1647_vm14 = vcmp.ge.f32.partialorder %v1335_v46, 0.0  ;;  %v1074_v8 = vpack.c.bf16 %v1000_v54, %v998_v5  ;;  %v590_v14 = vadd.f32 %v589_v47, %v2548_v4 }
 0x1ec   :  { %v1338_v52 = vpop.f32.mrf.mxu1  ;;  %v1001_v53 = vsel %vm745_vm12, %v586_v42, %v873_v49  ;;  %v592_v61 = vadd.f32 %v591_v51, %v2544_v3 }
 0x1ed   :  { %v1339_v56 = vadd.f32 %v1338_v52, %v2663_v9  ;;  %v593_v57 = vpop.f32.mrf.mxu0  ;;  %v1075_v2 = vpack.c.bf16 %v1001_v53, %v999_v58  ;;  %v2693_v13 = vsel %vm1647_vm14, %v1335_v46, %v1775_v55  ;;  %vm746_vm3 = vcmp.ge.f32.partialorder %v590_v14, 0.0 }
 0x1ee   :  { %v2689_v1 = vpop.f32.mrf.mxu1  ;;  %v594_v10 = vadd.f32 %v593_v57, %v2548_v4  ;;  %v875_v18 = vmul.f32 0.2, %v592_v61  ;;  %vm747_vm1 = vcmp.ge.f32.partialorder %v592_v61, 0.0  ;;  %v874_v28 = vmul.f32 0.2, %v590_v14 }
 0x1ef   :  { %vm1649_vm15 = vcmp.ge.f32.partialorder %v1339_v56, 0.0  ;;  %v1777_v6 = vmul.f32 0.2, %v1339_v56  ;;  %v595_v7 = vpop.f32.mrf.mxu0  ;;  %1582 = vmatprep.mubr.bf16.mxu1 %v1075_v2 }
 0x1f0   :  { %v596_v11 = vadd.f32 %v595_v7, %v2544_v3  ;;  %v1344_v12 = vpop.f32.mrf.mxu1  ;;  %1583 = vmatmul.mubr.bf16.gmra.mxu1 %v1074_v8  ;;  %v876_v23 = vmul.f32 0.2, %v594_v10  ;;  %vm748_vm2 = vcmp.ge.f32.partialorder %v594_v10, 0.0  ;;  %v1003_v30 = vsel %vm747_vm1, %v592_v61, %v875_v18 }
 0x1f1   :  { %v2696_v15 = vsel %vm1649_vm15, %v1339_v56, %v1777_v6  ;;  %v1345_v16 = vadd.f32 %v1344_v12, %v2663_v9  ;;  %v599_v17 = vpop.f32.mrf.mxu0  ;;  %v1002_v51 = vsel %vm746_vm3, %v590_v14, %v874_v28 }
 0x1f2   :  { %v2030_v19 = vpack.c.bf16 %v2696_v15, %v2693_v13  ;;  %vm749_vm0 = vcmp.ge.f32.partialorder %v596_v11, 0.0  ;;  %v877_v20 = vmul.f32 0.2, %v596_v11  ;;  %v2701_v63 = vpop.f32.mrf.mxu1  ;;  %v1004_v40 = vsel %vm748_vm2, %v594_v10, %v876_v23 }
 0x1f3   :  { %v601_v21 = vpop.f32.mrf.mxu0  ;;  %v1779_v25 = vmul.f32 0.2, %v1345_v16  ;;  %vm1651_vm4 = vcmp.ge.f32.partialorder %v1345_v16, 0.0  ;;  %v600_v46 = vadd.f32 %v599_v17, %v2548_v4  ;;  %v1076_v54 = vpack.c.bf16 %v1004_v40, %v1002_v51 }
 0x1f4   :  { %v1348_v24 = vpop.f32.mrf.mxu1  ;;  %v1005_v0 = vsel %vm749_vm0, %v596_v11, %v877_v20  ;;  %v602_v36 = vadd.f32 %v601_v21, %v2544_v3 }
 0x1f5   :  { %v1349_v26 = vadd.f32 %v1348_v24, %v2663_v9  ;;  %v603_v27 = vpop.f32.mrf.mxu0  ;;  %v1077_v35 = vpack.c.bf16 %v1005_v0, %v1003_v30  ;;  %v2710_v41 = vsel %vm1651_vm4, %v1345_v16, %v1779_v25  ;;  %v878_v5 = vmul.f32 0.2, %v600_v46 }
 0x1f6   :  { %v2704_v29 = vpop.f32.mrf.mxu1  ;;  %v604_v32 = vadd.f32 %v603_v27, %v2548_v4  ;;  %v879_v56 = vmul.f32 0.2, %v602_v36  ;;  %vm751_vm8 = vcmp.ge.f32.partialorder %v602_v36, 0.0  ;;  %vm750_vm10 = vcmp.ge.f32.partialorder %v600_v46, 0.0 }
 0x1f7   :  { %vm1653_vm5 = vcmp.ge.f32.partialorder %v1349_v26, 0.0  ;;  %v1781_v31 = vmul.f32 0.2, %v1349_v26  ;;  %v605_v34 = vpop.f32.mrf.mxu0  ;;  %1592 = vmatprep.mubr.bf16.mxu1 %v1077_v35  ;;  %v1006_v0 = vsel %vm750_vm10, %v600_v46, %v878_v5 }
 0x1f8   :  { %v606_v37 = vadd.f32 %v605_v34, %v2544_v3  ;;  %v1354_v38 = vpop.f32.mrf.mxu1  ;;  %v880_v53 = vmul.f32 0.2, %v604_v32  ;;  %vm752_vm7 = vcmp.ge.f32.partialorder %v604_v32, 0.0  ;;  %1593 = vmatmul.mubr.bf16.gmra.mxu1 %v1076_v54  ;;  %v1007_v17 = vsel %vm751_vm8, %v602_v36, %v879_v56 }
 0x1f9   :  { %v2712_v42 = vsel %vm1653_vm5, %v1349_v26, %v1781_v31  ;;  %v1355_v43 = vadd.f32 %v1354_v38, %v2663_v9  ;;  %v609_v44 = vpop.f32.mrf.mxu0 }
 0x1fa   :  { %v2032_v47 = vpack.c.bf16 %v2712_v42, %v2710_v41  ;;  %v881_v49 = vmul.f32 0.2, %v606_v37  ;;  %v2719_v52 = vpop.f32.mrf.mxu1  ;;  %vm753_vm6 = vcmp.ge.f32.partialorder %v606_v37, 0.0  ;;  %v1008_v8 = vsel %vm752_vm7, %v604_v32, %v880_v53 }
 0x1fb   :  { %v611_v55 = vpop.f32.mrf.mxu0  ;;  %v1783_v58 = vmul.f32 0.2, %v1355_v43  ;;  %vm1655_vm9 = vcmp.ge.f32.partialorder %v1355_v43, 0.0  ;;  %v610_v25 = vadd.f32 %v609_v44, %v2548_v4  ;;  %v1078_v28 = vpack.c.bf16 %v1008_v8, %v1006_v0 }
 0x1fc   :  { %v1358_v57 = vpop.f32.mrf.mxu1  ;;  %v1009_v7 = vsel %vm753_vm6, %v606_v37, %v881_v49  ;;  %v612_v12 = vadd.f32 %v611_v55, %v2544_v3  ;;  %v2746_v44 = vrot.slane %v2657_v60, %v201_v62 }
 0x1fd   :  { %v1359_v61 = vadd.f32 %v1358_v57, %v2663_v9  ;;  %v613_v2 = vpop.f32.mrf.mxu0  ;;  %v2730_v20 = vsel %vm1655_vm9, %v1355_v43, %v1783_v58  ;;  %v1079_v23 = vpack.c.bf16 %v1009_v7, %v1007_v17  ;;  %v882_v37 = vmul.f32 0.2, %v610_v25 }
 0x1fe   :  { %v2722_v6 = vpop.f32.mrf.mxu1  ;;  %v614_v14 = vadd.f32 %v613_v2, %v2548_v4  ;;  %v883_v32 = vmul.f32 0.2, %v612_v12  ;;  %vm755_vm13 = vcmp.ge.f32.partialorder %v612_v12, 0.0  ;;  %vm754_vm15 = vcmp.ge.f32.partialorder %v610_v25, 0.0 }
 0x1ff   :  { %vm1657_vm11 = vcmp.ge.f32.partialorder %v1359_v61, 0.0  ;;  %v1785_v10 = vmul.f32 0.2, %v1359_v61  ;;  %v615_v11 = vpop.f32.mrf.mxu0  ;;  %1602 = vmatprep.mubr.bf16.mxu1 %v1079_v23  ;;  %v1010_v58 = vsel %vm754_vm15, %v610_v25, %v882_v37  ;;  %v2758_v60 = vadd.f32 %v2669_v22, %v2746_v44 }
 0x200   :  { %v616_v16 = vadd.f32 %v615_v11, %v2544_v3  ;;  %v2728_v18 = vpop.f32.mrf.mxu1  ;;  %v884_v34 = vmul.f32 0.2, %v614_v14  ;;  %vm756_vm14 = vcmp.ge.f32.partialorder %v614_v14, 0.0  ;;  %1603 = vmatmul.mubr.bf16.gmra.mxu1 %v1078_v28  ;;  %v1011_v51 = vsel %vm755_vm13, %v612_v12, %v883_v32 }
 0x201   :  { %v2732_v21 = vsel %vm1657_vm11, %v1359_v61, %v1785_v10  ;;  %v619_v24 = vpop.f32.mrf.mxu0  ;;  %v2762_v5 = vadd.f32 %v2675_v33, %v2746_v44  ;;  %v1347_v33 = vadd.f32 %v2701_v63, %v2746_v44  ;;  %vm1644_vm11 = vcmp.ge.f32.partialorder %v2758_v60, 0.0 }
 0x202   :  { %v2034_v26 = vpack.c.bf16 %v2732_v21, %v2730_v20  ;;  %v2737_v27 = vpop.f32.mrf.mxu1  ;;  %vm757_vm12 = vcmp.ge.f32.partialorder %v616_v16, 0.0  ;;  %v885_v30 = vmul.f32 0.2, %v616_v16  ;;  %v1012_v46 = vsel %vm756_vm14, %v614_v14, %v884_v34 }
 0x203   :  { %v621_v31 = vpop.f32.mrf.mxu0  ;;  %v620_v61 = vadd.f32 %v619_v24, %v2548_v4  ;;  %v1080_v59 = vpack.c.bf16 %v1012_v46, %v1010_v58  ;;  %v2768_v14 = vadd.f32 %v2685_v50, %v2746_v44  ;;  %v2776_v24 = vmul.f32 0.2, %v2758_v60 }
 0x204   :  { %v2739_v35 = vpop.f32.mrf.mxu1  ;;  %v1013_v40 = vsel %vm757_vm12, %v616_v16, %v885_v30  ;;  %v622_v54 = vadd.f32 %v621_v31, %v2544_v3  ;;  %v2779_v0 = vmul.f32 0.2, %v2762_v5  ;;  %v2784_v30 = vadd.f32 %v2689_v1, %v2746_v44 }
 0x205   :  { %v623_v36 = vpop.f32.mrf.mxu0  ;;  %v1081_v56 = vpack.c.bf16 %v1013_v40, %v1011_v51  ;;  %v886_v16 = vmul.f32 0.2, %v620_v61  ;;  %vm758_vm3 = vcmp.ge.f32.partialorder %v620_v61, 0.0  ;;  %v2788_v34 = vmul.f32 0.2, %v2768_v14 }
 0x206   :  { %v2741_v38 = vpop.f32.mrf.mxu1  ;;  %v624_v49 = vadd.f32 %v623_v36, %v2548_v4  ;;  %v887_v10 = vmul.f32 0.2, %v622_v54  ;;  %vm759_vm1 = vcmp.ge.f32.partialorder %v622_v54, 0.0  ;;  %vm1648_vm4 = vcmp.ge.f32.partialorder %v2768_v14, 0.0 }
 0x207   :  { %v625_v43 = vpop.f32.mrf.mxu0  ;;  %1612 = vmatprep.mubr.bf16.mxu1 %v1081_v56  ;;  %v1014_v36 = vsel %vm758_vm3, %v620_v61, %v886_v16  ;;  %v1780_v46 = vmul.f32 0.2, %v1347_v33  ;;  %vm1646_vm7 = vcmp.ge.f32.partialorder %v2762_v5, 0.0  ;;  %vm1650_vm8 = vcmp.ge.f32.partialorder %v2784_v30, 0.0 }
 0x208   :  { %v2749_v53 = vpop.f32.mrf.mxu1  ;;  %v626_v55 = vadd.f32 %v625_v43, %v2544_v3  ;;  %v888_v7 = vmul.f32 0.2, %v624_v49  ;;  %vm760_vm0 = vcmp.ge.f32.partialorder %v624_v49, 0.0  ;;  %1613 = vmatmul.mubr.bf16.gmra.mxu1 %v1080_v59  ;;  %v1015_v31 = vsel %vm759_vm1, %v622_v54, %v887_v10 }
 0x209   :  { %v629_v57 = vpop.f32.mrf.mxu0  ;;  %vm1652_vm9 = vcmp.ge.f32.partialorder %v1347_v33, 0.0  ;;  %v2806_v56 = vadd.f32 %v2737_v27, %v2746_v44  ;;  %v2821_v16 = vadd.f32 %v2722_v6, %v2746_v44  ;;  %v2835_v6 = vadd.f32 %v2741_v38, %v2746_v44 }
 0x20a   :  { %v2754_v2 = vpop.f32.mrf.mxu1  ;;  %v889_v11 = vmul.f32 0.2, %v626_v55  ;;  %vm761_vm2 = vcmp.ge.f32.partialorder %v626_v55, 0.0  ;;  %v1016_v50 = vsel %vm760_vm0, %v624_v49, %v888_v7  ;;  %v630_v37 = vadd.f32 %v629_v57, %v2548_v4 }
 0x20b   :  { %v631_v62 = vpop.f32.mrf.mxu0  ;;  %v1351_v49 = vadd.f32 %v2704_v29, %v2746_v44  ;;  %v1082_v1 = vpack.c.bf16 %v1016_v50, %v1014_v36  ;;  %v1778_v29 = vmul.f32 0.2, %v2784_v30  ;;  %v2830_v50 = vmul.f32 0.2, %v2806_v56 }
 0x20c   :  { %v2764_v8 = vpop.f32.mrf.mxu1  ;;  %v632_v17 = vadd.f32 %v631_v62, %v2544_v3  ;;  %v1017_v32 = vsel %vm761_vm2, %v626_v55, %v889_v11  ;;  %v890_v57 = vmul.f32 0.2, %v630_v37  ;;  %vm762_vm13 = vcmp.ge.f32.partialorder %v630_v37, 0.0 }
 0x20d   :  { %v633_v12 = vpop.f32.mrf.mxu0  ;;  %v1083_v40 = vpack.c.bf16 %v1017_v32, %v1015_v31  ;;  %vm1654_vm12 = vcmp.ge.f32.partialorder %v1351_v49, 0.0  ;;  %v1782_v59 = vmul.f32 0.2, %v1351_v49  ;;  %v2839_v31 = vadd.f32 %v2749_v53, %v2663_v9 }
 0x20e   :  { %v2770_v22 = vpop.f32.mrf.mxu1  ;;  %v634_v25 = vadd.f32 %v633_v12, %v2548_v4  ;;  %v891_v51 = vmul.f32 0.2, %v632_v17  ;;  %vm763_vm5 = vcmp.ge.f32.partialorder %v632_v17, 0.0  ;;  %v2800_v4 = vadd.f32 %v2719_v52, %v2746_v44 }
 0x20f   :  { %v635_v23 = vpop.f32.mrf.mxu0  ;;  %1622 = vmatprep.mubr.bf16.mxu1 %v1083_v40  ;;  %v2811_v52 = vadd.f32 %v2754_v2, %v2746_v44  ;;  %v2814_v12 = vsel %vm1652_vm9, %v1347_v33, %v1780_v46  ;;  %v2827_v2 = vadd.f32 %v2728_v18, %v2663_v9  ;;  %v1018_v33 = vsel %vm762_vm13, %v630_v37, %v890_v57 }
 0x210   :  { %v1384_v28 = vpop.f32.mrf.mxu1  ;;  %v636_v63 = vadd.f32 %v635_v23, %v2544_v3  ;;  %v892_v3 = vmul.f32 0.2, %v634_v25  ;;  %vm764_vm10 = vcmp.ge.f32.partialorder %v634_v25, 0.0  ;;  %1623 = vmatmul.mubr.bf16.gmra.mxu1 %v1082_v1  ;;  %v1019_v62 = vsel %vm763_vm5, %v632_v17, %v891_v51 }
 0x211   :  { %v2817_v27 = vmul.f32 0.2, %v2800_v4  ;;  %v2843_v36 = vmul.f32 0.2, %v2811_v52  ;;  %v2847_v37 = vadd.f32 %v2770_v22, %v2746_v44  ;;  %v2850_v40 = vadd.f32 %v1384_v28, %v2663_v9 }
 0x212   :  { %v1386_v43 = vpop.f32.mrf.mxu1  ;;  %vm765_vm6 = vcmp.ge.f32.partialorder %v636_v63, 0.0  ;;  %v893_v54 = vmul.f32 0.2, %v636_v63  ;;  %v1020_v7 = vsel %vm764_vm10, %v634_v25, %v892_v3  ;;  %v2853_v38 = vsel %vm1654_vm12, %v1351_v49, %v1782_v59 }
 0x213   :  { %v1387_v23 = vadd.f32 %v1386_v43, %v2746_v44  ;;  %v1084_v32 = vpack.c.bf16 %v1020_v7, %v1018_v33  ;;  %v2033_v3 = vpack.c.bf16 %v2853_v38, %v2814_v12  ;;  %v2862_v22 = vsel %vm1648_vm4, %v2768_v14, %v2788_v34 }
 0x214   :  { %v2794_v55 = vpop.f32.mrf.mxu1  ;;  %v1021_v61 = vsel %vm765_vm6, %v636_v63, %v893_v54  ;;  %v2867_v28 = vsel %vm1650_vm8, %v2784_v30, %v1778_v29  ;;  %v2876_v14 = vsel %vm1646_vm7, %v2762_v5, %v2779_v0  ;;  %v2883_v29 = vsel %vm1644_vm11, %v2758_v60, %v2776_v24 }
 0x215   :  { %v1085_v10 = vpack.c.bf16 %v1021_v61, %v1019_v62  ;;  %v1796_v46 = vmul.f32 0.2, %v1387_v23  ;;  %v2031_v59 = vpack.c.bf16 %v2867_v28, %v2862_v22  ;;  %vm1668_vm3 = vcmp.ge.f32.partialorder %v1387_v23, 0.0 }
 0x216   :  { %v1390_v58 = vpop.f32.mrf.mxu1  ;;  %v1389_v62 = vadd.f32 %v2794_v55, %v2663_v9  ;;  %v2029_v5 = vpack.c.bf16 %v2876_v14, %v2883_v29  ;;  %vm1666_vm4 = vcmp.ge.f32.partialorder %v2847_v37, 0.0  ;;  %vm1667_vm8 = vcmp.ge.f32.partialorder %v2850_v40, 0.0 }
 0x217   :  { %v1391_v17 = vadd.f32 %v1390_v58, %v2746_v44  ;;  %1632 = vmatprep.mubr.bf16.mxu1 %v1085_v10  ;;  %vm1664_vm11 = vcmp.ge.f32.partialorder %v2811_v52, 0.0  ;;  %vm1662_vm12 = vcmp.ge.f32.partialorder %v2835_v6, 0.0 }
 0x218   :  { %v1394_v11 = vpop.f32.mrf.mxu1  ;;  %1633 = vmatmul.mubr.bf16.gmra.mxu1 %v1084_v32  ;;  %vm1669_vm6 = vcmp.ge.f32.partialorder %v1389_v62, 0.0 }
 0x219   :  { %v1395_v25 = vadd.f32 %v1394_v11, %v2663_v9  ;;  %vm1670_vm14 = vcmp.ge.f32.partialorder %v1391_v17, 0.0  ;;  %v1798_v53 = vmul.f32 0.2, %v1391_v17 }
 0x21a   :  { %v1396_v63 = vpop.f32.mrf.mxu1 }
 0x21b   :  { %v1397_v18 = vadd.f32 %v1396_v63, %v2746_v44  ;;  %vm1671_vm15 = vcmp.ge.f32.partialorder %v1395_v25, 0.0  ;;  %v1799_v58 = vmul.f32 0.2, %v1395_v25  ;;  %v1926_v63 = vsel %vm1670_vm14, %v1391_v17, %v1798_v53 }
 0x21c   :  { %v1398_v43 = vpop.f32.mrf.mxu1 }
 0x21d   :  { %v1399_v1 = vadd.f32 %v1398_v43, %v2663_v9  ;;  %v1800_v49 = vmul.f32 0.2, %v1397_v18  ;;  %vm1672_vm1 = vcmp.ge.f32.partialorder %v1397_v18, 0.0  ;;  %v1927_v60 = vsel %vm1671_vm15, %v1395_v25, %v1799_v58 }
 0x21e   :  { %v1400_v51 = vpop.f32.mrf.mxu1  ;;  %v1795_v58 = vmul.f32 0.2, %v2850_v40 }
 0x21f   :  { %vm1673_vm0 = vcmp.ge.f32.partialorder %v1399_v1, 0.0  ;;  %v1801_v54 = vmul.f32 0.2, %v1399_v1  ;;  %v1401_v57 = vadd.f32 %v1400_v51, %v2746_v44  ;;  %v1928_v11 = vsel %vm1672_vm1, %v1397_v18, %v1800_v49 }
 0x220   :  { %v1404_v61 = vpop.f32.mrf.mxu1  ;;  %v1797_v18 = vmul.f32 0.2, %v1389_v62 }
 0x221   :  { %vm1674_vm2 = vcmp.ge.f32.partialorder %v1401_v57, 0.0  ;;  %v1802_v30 = vmul.f32 0.2, %v1401_v57  ;;  %v1405_v34 = vadd.f32 %v1404_v61, %v2663_v9  ;;  %v1929_v7 = vsel %vm1673_vm0, %v1399_v1, %v1801_v54 }
 0x222   :  { %v1406_v10 = vpop.f32.mrf.mxu1  ;;  %v2042_v51 = vpack.c.bf16 %v1929_v7, %v1927_v60  ;;  %v1924_v1 = vsel %vm1668_vm3, %v1387_v23, %v1796_v46  ;;  %v1794_v54 = vmul.f32 0.2, %v2847_v37  ;;  %vm1663_vm0 = vcmp.ge.f32.partialorder %v2839_v31, 0.0 }
 0x223   :  { %v1407_v0 = vadd.f32 %v1406_v10, %v2746_v44  ;;  %v1930_v33 = vsel %vm1674_vm2, %v1401_v57, %v1802_v30  ;;  %v1803_v24 = vmul.f32 0.2, %v1405_v34  ;;  %vm1675_vm5 = vcmp.ge.f32.partialorder %v1405_v34, 0.0 }
 0x224   :  { %v1408_v32 = vpop.f32.mrf.mxu1  ;;  %v2043_v43 = vpack.c.bf16 %v1930_v33, %v1928_v11  ;;  %v2041_v17 = vpack.c.bf16 %v1926_v63, %v1924_v1  ;;  %v1379_v10 = vadd.f32 %v2764_v8, %v2663_v9  ;;  %v1925_v11 = vsel %vm1669_vm6, %v1389_v62, %v1797_v18 }
 0x225   :  { %v1409_v55 = vadd.f32 %v1408_v32, %v2663_v9  ;;  %v1804_v53 = vmul.f32 0.2, %v1407_v0  ;;  %v2900_v61 = vsel %vm1675_vm5, %v1405_v34, %v1803_v24  ;;  %vm1676_vm9 = vcmp.ge.f32.partialorder %v1407_v0, 0.0 }
 0x226   :  { %v1410_v49 = vpop.f32.mrf.mxu1  ;;  %2101 = vmatprep.subr.bf16.mxu0 %v2043_v43  ;;  %v1922_v60 = vsel %vm1666_vm4, %v2847_v37, %v1794_v54  ;;  %v1923_v8 = vsel %vm1667_vm8, %v2850_v40, %v1795_v58  ;;  %v1920_v37 = vsel %vm1664_vm11, %v2811_v52, %v2843_v36  ;;  %vm1665_vm14 = vcmp.ge.f32.partialorder %v1379_v10, 0.0 }
 0x227   :  { %vm1677_vm7 = vcmp.ge.f32.partialorder %v1409_v55, 0.0  ;;  %v1805_v57 = vmul.f32 0.2, %v1409_v55  ;;  %v1411_v25 = vadd.f32 %v1410_v49, %v2746_v44  ;;  %2102 = vmatpush1.bf16.xpose.msra.mxu0 %v2042_v51  ;;  %v2915_v24 = vsel %vm1676_vm9, %v1407_v0, %v1804_v53 }
 0x228   :  { %v1414_v23 = vpop.f32.mrf.mxu1  ;;  %2103 = vmatprep.subr.bf16.mxu0 %v2041_v17  ;;  %v1790_v0 = vmul.f32 0.2, %v2835_v6  ;;  %v1793_v54 = vmul.f32 0.2, %v1379_v10  ;;  %v2039_v40 = vpack.c.bf16 %v1922_v60, %v1920_v37  ;;  %vm1660_vm3 = vcmp.ge.f32.partialorder %v2806_v56, 0.0 }
 0x229   :  { %v2902_v46 = vsel %vm1677_vm7, %v1409_v55, %v1805_v57  ;;  %vm1678_vm10 = vcmp.ge.f32.partialorder %v1411_v25, 0.0  ;;  %v1806_v30 = vmul.f32 0.2, %v1411_v25  ;;  %v1415_v7 = vadd.f32 %v1414_v23, %v2663_v9 }
 0x22a   :  { %v1416_v33 = vpop.f32.mrf.mxu1  ;;  %v2040_v55 = vpack.c.bf16 %v1925_v11, %v1923_v8  ;;  %v1791_v57 = vmul.f32 0.2, %v2839_v31  ;;  %v1921_v11 = vsel %vm1665_vm14, %v1379_v10, %v1793_v54  ;;  %v1918_v8 = vsel %vm1662_vm12, %v2835_v6, %v1790_v0 }
 0x22b   :  { %v1417_v63 = vadd.f32 %v1416_v33, %v2746_v44  ;;  %v2917_v32 = vsel %vm1678_vm10, %v1411_v25, %v1806_v30  ;;  %v1807_v62 = vmul.f32 0.2, %v1415_v7  ;;  %vm1679_vm13 = vcmp.ge.f32.partialorder %v1415_v7, 0.0 }
 0x22c   :  { %v1418_v43 = vpop.f32.mrf.mxu1  ;;  %v2045_v51 = vpack.c.bf16 %v2917_v32, %v2915_v24  ;;  %v1369_v30 = vadd.f32 %v2739_v35, %v2663_v9  ;;  %vm1658_vm4 = vcmp.ge.f32.partialorder %v2821_v16, 0.0  ;;  %v1919_v35 = vsel %vm1663_vm0, %v2839_v31, %v1791_v57 }
 0x22d   :  { %v1419_v1 = vadd.f32 %v1418_v43, %v2663_v9  ;;  %v1808_v49 = vmul.f32 0.2, %v1417_v63  ;;  %v2934_v25 = vsel %vm1679_vm13, %v1415_v7, %v1807_v62  ;;  %vm1680_vm1 = vcmp.ge.f32.partialorder %v1417_v63, 0.0 }
 0x22e   :  { %v1420_v18 = vpop.f32.mrf.mxu1  ;;  %v2038_v37 = vpack.c.bf16 %v1921_v11, %v1919_v35  ;;  %v1916_v6 = vsel %vm1660_vm3, %v2806_v56, %v2830_v50  ;;  %vm1661_vm6 = vcmp.ge.f32.partialorder %v1369_v30, 0.0  ;;  %v1789_v0 = vmul.f32 0.2, %v1369_v30 }
 0x22f   :  { %vm1681_vm15 = vcmp.ge.f32.partialorder %v1419_v1, 0.0  ;;  %v1809_v17 = vmul.f32 0.2, %v1419_v1  ;;  %v1421_v53 = vadd.f32 %v1420_v18, %v2746_v44  ;;  %2104 = vmatpush1.bf16.xpose.msra.mxu0 %v2040_v55  ;;  %v2949_v62 = vsel %vm1680_vm1, %v1417_v63, %v1808_v49 }
 0x230   :  { %v1424_v52 = vpop.f32.mrf.mxu1  ;;  %2105 = vmatprep.subr.bf16.mxu0 %v2039_v40  ;;  %v1786_v63 = vmul.f32 0.2, %v2821_v16  ;;  %v2037_v31 = vpack.c.bf16 %v1918_v8, %v1916_v6  ;;  %vm1659_vm8 = vcmp.ge.f32.partialorder %v2827_v2, 0.0  ;;  %vm1656_vm11 = vcmp.ge.f32.partialorder %v2800_v4, 0.0 }
 0x231   :  { %v2936_v36 = vsel %vm1681_vm15, %v1419_v1, %v1809_v17  ;;  %vm1682_vm2 = vcmp.ge.f32.partialorder %v1421_v53, 0.0  ;;  %v1810_v58 = vmul.f32 0.2, %v1421_v53  ;;  %v1425_v23 = vadd.f32 %v1424_v52, %v2663_v9 }
 0x232   :  { %v2046_v7 = vpack.c.bf16 %v2936_v36, %v2934_v25  ;;  %v1426_v33 = vpop.f32.mrf.mxu1  ;;  %v1917_v11 = vsel %vm1661_vm6, %v1369_v30, %v1789_v0 }
 0x233   :  { %v1427_v60 = vadd.f32 %v1426_v33, %v2746_v44  ;;  %v2951_v43 = vsel %vm1682_vm2, %v1421_v53, %v1810_v58  ;;  %v1811_v10 = vmul.f32 0.2, %v1425_v23  ;;  %vm1683_vm5 = vcmp.ge.f32.partialorder %v1425_v23, 0.0 }
 0x234   :  { %v1428_v55 = vpop.f32.mrf.mxu1  ;;  %v2047_v1 = vpack.c.bf16 %v2951_v43, %v2949_v62  ;;  %v1787_v53 = vmul.f32 0.2, %v2827_v2 }
 0x235   :  { %v1429_v54 = vadd.f32 %v1428_v55, %v2663_v9  ;;  %v1812_v40 = vmul.f32 0.2, %v1427_v60  ;;  %v2968_v57 = vsel %vm1683_vm5, %v1425_v23, %v1811_v10  ;;  %vm1684_vm9 = vcmp.ge.f32.partialorder %v1427_v60, 0.0 }
 0x236   :  { %v1430_v18 = vpop.f32.mrf.mxu1  ;;  %v1914_v23 = vsel %vm1658_vm4, %v2821_v16, %v1786_v63  ;;  %v1915_v55 = vsel %vm1659_vm8, %v2827_v2, %v1787_v53 }
 0x237   :  { %vm1685_vm7 = vcmp.ge.f32.partialorder %v1429_v54, 0.0  ;;  %v1813_v49 = vmul.f32 0.2, %v1429_v54  ;;  %v1431_v17 = vadd.f32 %v1430_v18, %v2746_v44  ;;  %2106 = vmatpush1.bf16.xpose.msra.mxu0 %v2038_v37  ;;  %v2980_v35 = vsel %vm1684_vm9, %v1427_v60, %v1812_v40 }
 0x238   :  { %v1434_v56 = vpop.f32.mrf.mxu1  ;;  %2107 = vmatprep.subr.bf16.mxu0 %v2037_v31  ;;  %v1912_v18 = vsel %vm1656_vm11, %v2800_v4, %v2817_v27 }
 0x239   :  { %v2970_v50 = vsel %vm1685_vm7, %v1429_v54, %v1813_v49  ;;  %vm1686_vm10 = vcmp.ge.f32.partialorder %v1431_v17, 0.0  ;;  %v1814_v52 = vmul.f32 0.2, %v1431_v17  ;;  %v1435_v58 = vadd.f32 %v1434_v56, %v2663_v9 }
 0x23a   :  { %v2048_v33 = vpack.c.bf16 %v2970_v50, %v2968_v57  ;;  %v1436_v8 = vpop.f32.mrf.mxu1  ;;  %v2036_v54 = vpack.c.bf16 %v1917_v11, %v1915_v55  ;;  %v2035_v60 = vpack.c.bf16 %v1914_v23, %v1912_v18 }
 0x23b   :  { %v2982_v10 = vsel %vm1686_vm10, %v1431_v17, %v1814_v52  ;;  %v1815_v6 = vmul.f32 0.2, %v1435_v58  ;;  %vm1687_vm12 = vcmp.ge.f32.partialorder %v1435_v58, 0.0  ;;  %v3025_v41 = vadd.f32 %v1436_v8, %v2746_v44 }
 0x23c   :  { %v1438_v37 = vpop.f32.mrf.mxu1  ;;  %v2049_v30 = vpack.c.bf16 %v2982_v10, %v2980_v35 }
 0x23d   :  { %v1439_v0 = vadd.f32 %v1438_v37, %v2663_v9  ;;  %v2994_v2 = vsel %vm1687_vm12, %v1435_v58, %v1815_v6  ;;  %v3038_v28 = vmul.f32 0.2, %v3025_v41 }
 0x23e   :  { %v1440_v16 = vpop.f32.mrf.mxu1 }
 0x23f   :  { %vm1689_vm13 = vcmp.ge.f32.partialorder %v1439_v0, 0.0  ;;  %v1817_v63 = vmul.f32 0.2, %v1439_v0  ;;  %2108 = vmatpush1.bf16.xpose.msra.mxu0 %v2036_v54 }
 0x240   :  { %v2992_v31 = vpop.f32.mrf.mxu1  ;;  %2109 = vmatprep.subr.bf16.mxu0 %v2035_v60 }
 0x241   :  { %v2996_v40 = vsel %vm1689_vm13, %v1439_v0, %v1817_v63 }
 0x242   :  { %v2050_v49 = vpack.c.bf16 %v2996_v40, %v2994_v2  ;;  %v1446_v17 = vpop.f32.mrf.mxu1 }
 0x243   :  { %v3028_v42 = vadd.f32 %v1446_v17, %v2746_v44 }
 0x244   :  { %v3000_v53 = vpop.f32.mrf.mxu1 }
 0x245   :  { %v3044_v14 = vmul.f32 0.2, %v3028_v42 }
 0x246   :  { %v1450_v4 = vpop.f32.mrf.mxu1 }
 0x247   :  { %2110 = vmatpush1.bf16.xpose.msra.mxu0 %v2034_v26 }
 0x248   :  { %v3005_v27 = vpop.f32.mrf.mxu1  ;;  %2111 = vmatprep.subr.bf16.mxu0 %v2033_v3 }
 0x24a   :  { %v1456_v56 = vpop.f32.mrf.mxu1 }
 0x24c   :  { %v3010_v52 = vpop.f32.mrf.mxu1 }
 0x24e   :  { %v1460_v58 = vpop.f32.mrf.mxu1 }
 0x24f   :  { %2112 = vmatpush1.bf16.xpose.msra.mxu0 %v2032_v47  ;;  %v3031_v47 = vadd.f32 %v1456_v56, %v2746_v44  ;;  %v3054_v23 = vadd.f32 %v1460_v58, %v2746_v44 }
 0x250   :  { %v1464_v11 = vpop.f32.mrf.mxu1  ;;  %2113 = vmatprep.subr.bf16.mxu0 %v2031_v59  ;;  %v3041_v59 = vadd.f32 %v1440_v16, %v2746_v44 }
 0x251   :  { %v3051_v8 = vmul.f32 0.2, %v3031_v47  ;;  %vm1698_vm3 = vcmp.ge.f32.partialorder %v3054_v23, 0.0  ;;  %vm1696_vm12 = vcmp.ge.f32.partialorder %v3031_v47, 0.0 }
 0x252   :  { %v1466_v20 = vpop.f32.mrf.mxu1 }
 0x253   :  { %v1467_v15 = vadd.f32 %v1466_v20, %v2746_v44 }
 0x254   :  { %v1468_v21 = vpop.f32.mrf.mxu1 }
 0x255   :  { %v1828_v18 = vmul.f32 0.2, %v1467_v15  ;;  %vm1700_vm4 = vcmp.ge.f32.partialorder %v1467_v15, 0.0 }
 0x256   :  { %v1470_v26 = vpop.f32.mrf.mxu1 }
 0x257   :  { %2114 = vmatpush1.bf16.xpose.msra.mxu0 %v2030_v19  ;;  %v1471_v38 = vadd.f32 %v1470_v26, %v2746_v44  ;;  %v1465_v26 = vadd.f32 %v1464_v11, %v2663_v9 }
 0x258   :  { %v1474_v12 = vpop.f32.mrf.mxu1  ;;  %2115 = vmatprep.subr.bf16.mxu0 %v2029_v5  ;;  %v3048_v5 = vadd.f32 %v1450_v4, %v2746_v44  ;;  %v1469_v4 = vadd.f32 %v1468_v21, %v2663_v9  ;;  %v1956_v21 = vsel %vm1700_vm4, %v1467_v15, %v1828_v18  ;;  %vm1692_vm4 = vcmp.ge.f32.partialorder %v3028_v42, 0.0 }
 0x259   :  { %v1475_v19 = vadd.f32 %v1474_v12, %v2663_v9  ;;  %v1830_v55 = vmul.f32 0.2, %v1471_v38  ;;  %vm1702_vm15 = vcmp.ge.f32.partialorder %v1471_v38, 0.0  ;;  %vm1699_vm9 = vcmp.ge.f32.partialorder %v1465_v26, 0.0 }
 0x25a   :  { %v1476_v3 = vpop.f32.mrf.mxu1  ;;  %vm1701_vm6 = vcmp.ge.f32.partialorder %v1469_v4, 0.0  ;;  %vm1694_vm8 = vcmp.ge.f32.partialorder %v3048_v5, 0.0 }
 0x25b   :  { %v1477_v13 = vadd.f32 %v1476_v3, %v2746_v44  ;;  %v1831_v16 = vmul.f32 0.2, %v1475_v19  ;;  %vm1703_vm1 = vcmp.ge.f32.partialorder %v1475_v19, 0.0  ;;  %v1958_v20 = vsel %vm1702_vm15, %v1471_v38, %v1830_v55 }
 0x25c   :  { %v1478_v22 = vpop.f32.mrf.mxu1  ;;  %v1827_v55 = vmul.f32 0.2, %v1465_v26 }
 0x25d   :  { %v1479_v29 = vadd.f32 %v1478_v22, %v2663_v9  ;;  %v1832_v54 = vmul.f32 0.2, %v1477_v13  ;;  %vm1704_vm0 = vcmp.ge.f32.partialorder %v1477_v13, 0.0  ;;  %v1959_v12 = vsel %vm1703_vm1, %v1475_v19, %v1831_v16 }
 0x25e   :  { %v1480_v37 = vpop.f32.mrf.mxu1 }
 0x25f   :  { %vm1705_vm14 = vcmp.ge.f32.partialorder %v1479_v29, 0.0  ;;  %v1833_v6 = vmul.f32 0.2, %v1479_v29  ;;  %v1481_v0 = vadd.f32 %v1480_v37, %v2746_v44  ;;  %2116 = vmatpush1.bf16.xpose.msra.mxu0 %v2028_v48  ;;  %v1960_v45 = vsel %vm1704_vm0, %v1477_v13, %v1832_v54 }
 0x260   :  { %v1484_v60 = vpop.f32.mrf.mxu1  ;;  %v2057_v54 = vpack.c.bf16 %v1958_v20, %v1956_v21  ;;  %vm1690_vm0 = vcmp.ge.f32.partialorder %v3041_v59, 0.0 }
 0x261   :  { %vm1706_vm2 = vcmp.ge.f32.partialorder %v1481_v0, 0.0  ;;  %v1834_v63 = vmul.f32 0.2, %v1481_v0  ;;  %v1485_v17 = vadd.f32 %v1484_v60, %v2663_v9  ;;  %v1961_v56 = vsel %vm1705_vm14, %v1479_v29, %v1833_v6 }
 0x262   :  { %v1486_v58 = vpop.f32.mrf.mxu1  ;;  %v2058_v60 = vpack.c.bf16 %v1961_v56, %v1959_v12  ;;  %v1826_v29 = vmul.f32 0.2, %v3054_v23  ;;  %v1829_v6 = vmul.f32 0.2, %v1469_v4  ;;  %v1459_v56 = vadd.f32 %v3010_v52, %v2663_v9 }
 0x263   :  { %v1487_v39 = vadd.f32 %v1486_v58, %v2746_v44  ;;  %v1962_v48 = vsel %vm1706_vm2, %v1481_v0, %v1834_v63  ;;  %v1835_v3 = vmul.f32 0.2, %v1485_v17  ;;  %vm1707_vm5 = vcmp.ge.f32.partialorder %v1485_v17, 0.0 }
 0x264   :  { %v1488_v22 = vpop.f32.mrf.mxu1  ;;  %v2059_v37 = vpack.c.bf16 %v1962_v48, %v1960_v45  ;;  %v1957_v58 = vsel %vm1701_vm6, %v1469_v4, %v1829_v6  ;;  %v1955_v52 = vsel %vm1699_vm9, %v1465_v26, %v1827_v55  ;;  %vm1697_vm14 = vcmp.ge.f32.partialorder %v1459_v56, 0.0 }
 0x265   :  { %v1489_v34 = vadd.f32 %v1488_v22, %v2663_v9  ;;  %v1836_v38 = vmul.f32 0.2, %v1487_v39  ;;  %v3073_v0 = vsel %vm1707_vm5, %v1485_v17, %v1835_v3  ;;  %vm1708_vm10 = vcmp.ge.f32.partialorder %v1487_v39, 0.0 }
 0x266   :  { %v1490_v13 = vpop.f32.mrf.mxu1  ;;  %2117 = vmatprep.subr.bf16.mxu0 %v2059_v37  ;;  %v1455_v3 = vadd.f32 %v3005_v27, %v2663_v9  ;;  %v1825_v27 = vmul.f32 0.2, %v1459_v56 }
 0x267   :  { %vm1709_vm7 = vcmp.ge.f32.partialorder %v1489_v34, 0.0  ;;  %v1837_v11 = vmul.f32 0.2, %v1489_v34  ;;  %v1491_v19 = vadd.f32 %v1490_v13, %v2746_v44  ;;  %2118 = vmatpush2.bf16.xpose.msra.mxu0 %v2058_v60  ;;  %v3088_v20 = vsel %vm1708_vm10, %v1487_v39, %v1836_v38 }
 0x268   :  { %v1494_v15 = vpop.f32.mrf.mxu1  ;;  %2119 = vmatprep.subr.bf16.mxu0 %v2057_v54  ;;  %v2056_v60 = vpack.c.bf16 %v1957_v58, %v1955_v52  ;;  %v1822_v39 = vmul.f32 0.2, %v3048_v5  ;;  %vm1695_vm1 = vcmp.ge.f32.partialorder %v1455_v3, 0.0  ;;  %v1823_v38 = vmul.f32 0.2, %v1455_v3 }
 0x269   :  { %v3075_v18 = vsel %vm1709_vm7, %v1489_v34, %v1837_v11  ;;  %vm1710_vm11 = vcmp.ge.f32.partialorder %v1491_v19, 0.0  ;;  %v1838_v16 = vmul.f32 0.2, %v1491_v19  ;;  %v1495_v63 = vadd.f32 %v1494_v15, %v2663_v9 }
 0x26a   :  { %v2060_v17 = vpack.c.bf16 %v3075_v18, %v3073_v0  ;;  %v1496_v45 = vpop.f32.mrf.mxu1  ;;  %v1954_v34 = vsel %vm1698_vm3, %v3054_v23, %v1826_v29  ;;  %v1952_v23 = vsel %vm1696_vm12, %v3031_v47, %v3051_v8  ;;  %v1449_v15 = vadd.f32 %v3000_v53, %v2663_v9 }
 0x26b   :  { %v1497_v48 = vadd.f32 %v1496_v45, %v2746_v44  ;;  %v3090_v12 = vsel %vm1710_vm11, %v1491_v19, %v1838_v16  ;;  %v1839_v4 = vmul.f32 0.2, %v1495_v63  ;;  %vm1711_vm13 = vcmp.ge.f32.partialorder %v1495_v63, 0.0 }
 0x26c   :  { %v1498_v22 = vpop.f32.mrf.mxu1  ;;  %v2061_v37 = vpack.c.bf16 %v3090_v12, %v3088_v20  ;;  %v2055_v26 = vpack.c.bf16 %v1954_v34, %v1952_v23  ;;  %v1953_v16 = vsel %vm1697_vm14, %v1459_v56, %v1825_v27  ;;  %v1950_v34 = vsel %vm1694_vm8, %v3048_v5, %v1822_v39 }
 0x26d   :  { %v1499_v21 = vadd.f32 %v1498_v22, %v2663_v9  ;;  %v1840_v6 = vmul.f32 0.2, %v1497_v48  ;;  %v3106_v11 = vsel %vm1711_vm13, %v1495_v63, %v1839_v4  ;;  %vm1712_vm2 = vcmp.ge.f32.partialorder %v1497_v48, 0.0 }
 0x26e   :  { %v1500_v29 = vpop.f32.mrf.mxu1  ;;  %v1445_v22 = vadd.f32 %v2992_v31, %v2663_v9  ;;  %v1951_v53 = vsel %vm1695_vm1, %v1455_v3, %v1823_v38  ;;  %v1948_v5 = vsel %vm1692_vm4, %v3028_v42, %v3044_v14  ;;  %vm1693_vm6 = vcmp.ge.f32.partialorder %v1449_v15, 0.0 }
 0x26f   :  { %vm1713_vm15 = vcmp.ge.f32.partialorder %v1499_v21, 0.0  ;;  %v1841_v13 = vmul.f32 0.2, %v1499_v21  ;;  %v1501_v54 = vadd.f32 %v1500_v29, %v2746_v44  ;;  %2120 = vmatpush2.bf16.xpose.msra.mxu0 %v2056_v60  ;;  %v3121_v52 = vsel %vm1712_vm2, %v1497_v48, %v1840_v6 }
 0x270   :  { %v1504_v47 = vpop.f32.mrf.mxu1  ;;  %2121 = vmatprep.subr.bf16.mxu0 %v2055_v26  ;;  %v2054_v23 = vpack.c.bf16 %v1953_v16, %v1951_v53  ;;  %v1818_v48 = vmul.f32 0.2, %v3041_v59  ;;  %v1821_v31 = vmul.f32 0.2, %v1449_v15  ;;  %v2053_v3 = vpack.c.bf16 %v1950_v34, %v1948_v5 }
 0x271   :  { %v3108_v8 = vsel %vm1713_vm15, %v1499_v21, %v1841_v13  ;;  %vm1714_vm3 = vcmp.ge.f32.partialorder %v1501_v54, 0.0  ;;  %v1842_v19 = vmul.f32 0.2, %v1501_v54  ;;  %v1505_v55 = vadd.f32 %v1504_v47, %v2663_v9 }
 0x272   :  { %v2062_v63 = vpack.c.bf16 %v3108_v8, %v3106_v11  ;;  %v1506_v58 = vpop.f32.mrf.mxu1  ;;  %vm1691_vm8 = vcmp.ge.f32.partialorder %v1445_v22, 0.0  ;;  %v1819_v13 = vmul.f32 0.2, %v1445_v22  ;;  %vm1688_vm11 = vcmp.ge.f32.partialorder %v3025_v41, 0.0 }
 0x273   :  { %v1507_v45 = vadd.f32 %v1506_v58, %v2746_v44  ;;  %v3123_v4 = vsel %vm1714_vm3, %v1501_v54, %v1842_v19  ;;  %v1843_v56 = vmul.f32 0.2, %v1505_v55  ;;  %vm1715_vm5 = vcmp.ge.f32.partialorder %v1505_v55, 0.0 }
 0x274   :  { %v1508_v60 = vpop.f32.mrf.mxu1  ;;  %v2063_v21 = vpack.c.bf16 %v3123_v4, %v3121_v52  ;;  %v1949_v19 = vsel %vm1693_vm6, %v1449_v15, %v1821_v31  ;;  %v1944_v31 = vsel %vm1688_vm11, %v3025_v41, %v3038_v28 }
 0x275   :  { %v1509_v27 = vadd.f32 %v1508_v60, %v2663_v9  ;;  %v1844_v29 = vmul.f32 0.2, %v1507_v45  ;;  %v3137_v54 = vsel %vm1715_vm5, %v1505_v55, %v1843_v56  ;;  %vm1716_vm9 = vcmp.ge.f32.partialorder %v1507_v45, 0.0 }
 0x276   :  { %v1510_v39 = vpop.f32.mrf.mxu1  ;;  %v1946_v55 = vsel %vm1690_vm0, %v3041_v59, %v1818_v48  ;;  %v1947_v56 = vsel %vm1691_vm8, %v1445_v22, %v1819_v13 }
 0x277   :  { %vm1717_vm7 = vcmp.ge.f32.partialorder %v1509_v27, 0.0  ;;  %v1845_v26 = vmul.f32 0.2, %v1509_v27  ;;  %v1511_v6 = vadd.f32 %v1510_v39, %v2746_v44  ;;  %2122 = vmatpush2.bf16.xpose.msra.mxu0 %v2054_v23  ;;  %v3149_v34 = vsel %vm1716_vm9, %v1507_v45, %v1844_v29 }
 0x278   :  { %v1514_v38 = vpop.f32.mrf.mxu1  ;;  %2123 = vmatprep.subr.bf16.mxu0 %v2053_v3  ;;  %v2051_v59 = vpack.c.bf16 %v1946_v55, %v1944_v31 }
 0x279   :  { %v3139_v42 = vsel %vm1717_vm7, %v1509_v27, %v1845_v26  ;;  %vm1718_vm10 = vcmp.ge.f32.partialorder %v1511_v6, 0.0  ;;  %v1846_v14 = vmul.f32 0.2, %v1511_v6  ;;  %v1515_v47 = vadd.f32 %v1514_v38, %v2663_v9 }
 0x27a   :  { %v2064_v16 = vpack.c.bf16 %v3139_v42, %v3137_v54  ;;  %v1516_v58 = vpop.f32.mrf.mxu1  ;;  %v2052_v27 = vpack.c.bf16 %v1949_v19, %v1947_v56 }
 0x27b   :  { %v3151_v53 = vsel %vm1718_vm10, %v1511_v6, %v1846_v14  ;;  %v1847_v15 = vmul.f32 0.2, %v1515_v47  ;;  %vm1719_vm12 = vcmp.ge.f32.partialorder %v1515_v47, 0.0 }
 0x27c   :  { %v1518_v60 = vpop.f32.mrf.mxu1  ;;  %v2065_v23 = vpack.c.bf16 %v3151_v53, %v3149_v34 }
 0x27d   :  { %v1519_v5 = vadd.f32 %v1518_v60, %v2663_v9  ;;  %v3163_v22 = vsel %vm1719_vm12, %v1515_v47, %v1847_v15  ;;  %v3438_v15 = vpack.c.bf16 %v2902_v46, %v2900_v61 }
 0x27e   :  { %v3159_v39 = vpop.f32.mrf.mxu1 }
 0x27f   :  { %vm1721_vm13 = vcmp.ge.f32.partialorder %v1519_v5, 0.0  ;;  %v1849_v45 = vmul.f32 0.2, %v1519_v5  ;;  %2124 = vmatpush2.bf16.xpose.msra.mxu0 %v2052_v27 }
 0x280   :  { %v3161_v48 = vpop.f32.mrf.mxu1  ;;  %2125 = vmatprep.subr.bf16.mxu0 %v2051_v59 }
 0x281   :  { %v3165_v3 = vsel %vm1721_vm13, %v1519_v5, %v1849_v45 }
 0x282   :  { %v2066_v29 = vpack.c.bf16 %v3165_v3, %v3163_v22  ;;  %v1526_v26 = vpop.f32.mrf.mxu1 }
 0x284   :  { %v3169_v6 = vpop.f32.mrf.mxu1 }
 0x286   :  { %v1530_v41 = vpop.f32.mrf.mxu1 }
 0x287   :  { %2126 = vmatpush2.bf16.xpose.msra.mxu0 %v2050_v49  ;;  %v3205_v24 = vadd.f32 %v1530_v41, %v2746_v44 }
 0x288   :  { %v3174_v28 = vpop.f32.mrf.mxu1  ;;  %2127 = vmatprep.subr.bf16.mxu0 %v2049_v30 }
 0x28a   :  { %v1536_v13 = vpop.f32.mrf.mxu1 }
 0x28b   :  { %v3192_v57 = vadd.f32 %v1536_v13, %v2746_v44 }
 0x28c   :  { %v1538_v38 = vpop.f32.mrf.mxu1 }
 0x28d   :  { %v3208_v32 = vmul.f32 0.2, %v3192_v57  ;;  %v3212_v10 = vadd.f32 %v1538_v38, %v2663_v9  ;;  %vm1728_vm12 = vcmp.ge.f32.partialorder %v3192_v57, 0.0 }
 0x28e   :  { %v1540_v14 = vpop.f32.mrf.mxu1 }
 0x28f   :  { %2128 = vmatpush2.bf16.xpose.msra.mxu0 %v2048_v33  ;;  %v3198_v33 = vadd.f32 %v1516_v58, %v2746_v44  ;;  %v3215_v30 = vadd.f32 %v1540_v14, %v2746_v44  ;;  %vm1729_vm13 = vcmp.ge.f32.partialorder %v3212_v10, 0.0 }
 0x290   :  { %v1544_v47 = vpop.f32.mrf.mxu1  ;;  %2129 = vmatprep.subr.bf16.mxu0 %v2047_v1 }
 0x291   :  { %v1858_v41 = vmul.f32 0.2, %v3215_v30  ;;  %v1545_v13 = vadd.f32 %v1544_v47, %v2663_v9  ;;  %vm1730_vm7 = vcmp.ge.f32.partialorder %v3215_v30, 0.0 }
 0x292   :  { %v1546_v2 = vpop.f32.mrf.mxu1 }
 0x293   :  { %v1547_v50 = vadd.f32 %v1546_v2, %v2746_v44  ;;  %vm1731_vm8 = vcmp.ge.f32.partialorder %v1545_v13, 0.0 }
 0x294   :  { %v1548_v40 = vpop.f32.mrf.mxu1 }
 0x295   :  { %v1860_v19 = vmul.f32 0.2, %v1547_v50  ;;  %v1549_v5 = vadd.f32 %v1548_v40, %v2663_v9  ;;  %vm1732_vm3 = vcmp.ge.f32.partialorder %v1547_v50, 0.0 }
 0x296   :  { %v1550_v49 = vpop.f32.mrf.mxu1 }
 0x297   :  { %2130 = vmatpush2.bf16.xpose.msra.mxu0 %v2046_v7  ;;  %v1551_v62 = vadd.f32 %v1550_v49, %v2746_v44  ;;  %v3202_v7 = vadd.f32 %v1526_v26, %v2746_v44  ;;  %vm1733_vm4 = vcmp.ge.f32.partialorder %v1549_v5, 0.0  ;;  %v1861_v49 = vmul.f32 0.2, %v1549_v5 }
 0x298   :  { %v1554_v35 = vpop.f32.mrf.mxu1  ;;  %2131 = vmatprep.subr.bf16.mxu0 %v2045_v51 }
 0x299   :  { %v1555_v25 = vadd.f32 %v1554_v35, %v2663_v9  ;;  %v1862_v58 = vmul.f32 0.2, %v1551_v62  ;;  %vm1734_vm15 = vcmp.ge.f32.partialorder %v1551_v62, 0.0  ;;  %vm1724_vm11 = vcmp.ge.f32.partialorder %v3202_v7, 0.0 }
 0x29a   :  { %v1556_v43 = vpop.f32.mrf.mxu1 }
 0x29b   :  { %v1557_v1 = vadd.f32 %v1556_v43, %v2746_v44  ;;  %v1863_v31 = vmul.f32 0.2, %v1555_v25  ;;  %vm1735_vm1 = vcmp.ge.f32.partialorder %v1555_v25, 0.0  ;;  %v1990_v40 = vsel %vm1734_vm15, %v1551_v62, %v1862_v58 }
 0x29c   :  { %v1558_v36 = vpop.f32.mrf.mxu1  ;;  %vm1726_vm15 = vcmp.ge.f32.partialorder %v3205_v24, 0.0 }
 0x29d   :  { %v1559_v51 = vadd.f32 %v1558_v36, %v2663_v9  ;;  %v1864_v56 = vmul.f32 0.2, %v1557_v1  ;;  %vm1736_vm0 = vcmp.ge.f32.partialorder %v1557_v1, 0.0  ;;  %v1991_v35 = vsel %vm1735_vm1, %v1555_v25, %v1863_v31 }
 0x29e   :  { %v1560_v55 = vpop.f32.mrf.mxu1 }
 0x29f   :  { %vm1737_vm14 = vcmp.ge.f32.partialorder %v1559_v51, 0.0  ;;  %v1865_v60 = vmul.f32 0.2, %v1559_v51  ;;  %v1561_v27 = vadd.f32 %v1560_v55, %v2746_v44  ;;  %2132 = vmatpush2.bf16.xpose.msra.mxu0 %v3438_v15  ;;  %v1992_v14 = vsel %vm1736_vm0, %v1557_v1, %v1864_v56  ;;  %v2027_v55 = vld [vmem:[%s3435_s5] sm:$0xff] }
 0x2a0   :  { %v1564_v59 = vpop.f32.mrf.mxu1  ;;  %v3233_v62 = vcombine.low %v2027_v55, %v2027_v55  ;;  %v2267_v58 = vcombine.high %v2027_v55, %v2027_v55 }
 0x2a1   :  { %vm1738_vm2 = vcmp.ge.f32.partialorder %v1561_v27, 0.0  ;;  %v1866_v45 = vmul.f32 0.2, %v1561_v27  ;;  %v1565_v26 = vadd.f32 %v1564_v59, %v2663_v9  ;;  %v1993_v38 = vsel %vm1737_vm14, %v1559_v51, %v1865_v60 }
 0x2a2   :  { %v1566_v61 = vpop.f32.mrf.mxu1  ;;  %v2074_v47 = vpack.c.bf16 %v1993_v38, %v1991_v35  ;;  %v1988_v60 = vsel %vm1732_vm3, %v1547_v50, %v1860_v19  ;;  %v1859_v59 = vmul.f32 0.2, %v1545_v13  ;;  %2133 = vmatprep.mubr.bf16.mxu0 %v2267_v58  ;;  %2174 = vmatprep.mubr.bf16.mxu1 %v2267_v58  ;;  %v1986_v35 = vsel %vm1730_vm7, %v3215_v30, %v1858_v41 }
 0x2a3   :  { %v1567_v46 = vadd.f32 %v1566_v61, %v2746_v44  ;;  %v1994_v2 = vsel %vm1738_vm2, %v1561_v27, %v1866_v45  ;;  %v1867_v15 = vmul.f32 0.2, %v1565_v26  ;;  %vm1739_vm5 = vcmp.ge.f32.partialorder %v1565_v26, 0.0 }
 0x2a4   :  { %v1568_v43 = vpop.f32.mrf.mxu1  ;;  %v2075_v36 = vpack.c.bf16 %v1994_v2, %v1992_v14  ;;  %v2073_v56 = vpack.c.bf16 %v1990_v40, %v1988_v60  ;;  %v1989_v61 = vsel %vm1733_vm4, %v1549_v5, %v1861_v49  ;;  %v1535_v2 = vadd.f32 %v3174_v28, %v2663_v9 }
 0x2a5   :  { %v1569_v51 = vadd.f32 %v1568_v43, %v2663_v9  ;;  %v1868_v25 = vmul.f32 0.2, %v1567_v46  ;;  %vm1740_vm9 = vcmp.ge.f32.partialorder %v1567_v46, 0.0  ;;  %v3238_v50 = vsel %vm1739_vm5, %v1565_v26, %v1867_v15 }
 0x2a6   :  { %v1570_v1 = vpop.f32.mrf.mxu1  ;;  %2142 = vmatprep.subr.bf16.mxu1 %v2075_v36  ;;  %2134 = vmatmul.mubr.bf16.vlgmr.msra.gmra.mxu0 %v3233_v62  ;;  %v1852_v5 = vmul.f32 0.2, %v3202_v7  ;;  %v1987_v49 = vsel %vm1731_vm8, %v1545_v13, %v1859_v59  ;;  %v1857_v28 = vmul.f32 0.2, %v3212_v10  ;;  %v1984_v30 = vsel %vm1728_vm12, %v3192_v57, %v3208_v32 }
 0x2a7   :  { %vm1741_vm6 = vcmp.ge.f32.partialorder %v1569_v51, 0.0  ;;  %v1869_v27 = vmul.f32 0.2, %v1569_v51  ;;  %v1571_v31 = vadd.f32 %v1570_v1, %v2746_v44  ;;  %2143 = vmatpush1.bf16.xpose.msra.mxu1 %v2074_v47  ;;  %v3255_v43 = vsel %vm1740_vm9, %v1567_v46, %v1868_v25 }
 0x2a8   :  { %2144 = vmatprep.subr.bf16.mxu1 %v2073_v56  ;;  %v1574_v38 = vpop.f32.mrf.mxu1  ;;  %v2072_v15 = vpack.c.bf16 %v1989_v61, %v1987_v49  ;;  %v2071_v13 = vpack.c.bf16 %v1986_v35, %v1984_v30  ;;  %v1529_v46 = vadd.f32 %v3169_v6, %v2663_v9  ;;  %v1854_v1 = vmul.f32 0.2, %v3205_v24 }
 0x2a9   :  { %v3240_v19 = vsel %vm1741_vm6, %v1569_v51, %v1869_v27  ;;  %vm1742_vm10 = vcmp.ge.f32.partialorder %v1571_v31, 0.0  ;;  %v1870_v45 = vmul.f32 0.2, %v1571_v31  ;;  %v1575_v26 = vadd.f32 %v1574_v38, %v2663_v9 }
 0x2aa   :  { %v2076_v14 = vpack.c.bf16 %v3240_v19, %v3238_v50  ;;  %v1576_v40 = vpop.f32.mrf.mxu1  ;;  %v1855_v56 = vmul.f32 0.2, %v1535_v2  ;;  %vm1727_vm1 = vcmp.ge.f32.partialorder %v1535_v2, 0.0  ;;  %v1985_v32 = vsel %vm1729_vm13, %v3212_v10, %v1857_v28 }
 0x2ab   :  { %v3257_v36 = vsel %vm1742_vm10, %v1571_v31, %v1870_v45  ;;  %v1577_v55 = vadd.f32 %v1576_v40, %v2746_v44  ;;  %v1871_v51 = vmul.f32 0.2, %v1575_v26  ;;  %vm1743_vm14 = vcmp.ge.f32.partialorder %v1575_v26, 0.0 }
 0x2ac   :  { %v2077_v47 = vpack.c.bf16 %v3257_v36, %v3255_v43  ;;  %v1578_v60 = vpop.f32.mrf.mxu1  ;;  %vm1720_vm3 = vcmp.ge.f32.partialorder %v3198_v33, 0.0  ;;  %v1521_v61 = vadd.f32 %v3159_v39, %v2746_v44  ;;  %v1525_v40 = vadd.f32 %v3161_v48, %v2663_v9 }
 0x2ad   :  { %v1579_v41 = vadd.f32 %v1578_v60, %v2663_v9  ;;  %v1872_v25 = vmul.f32 0.2, %v1577_v55  ;;  %v3280_v6 = vsel %vm1743_vm14, %v1575_v26, %v1871_v51  ;;  %vm1744_vm2 = vcmp.ge.f32.partialorder %v1577_v55, 0.0 }
 0x2ae   :  { %v1580_v58 = vpop.f32.mrf.mxu1  ;;  %v1982_v35 = vsel %vm1726_vm15, %v3205_v24, %v1854_v1  ;;  %v1983_v49 = vsel %vm1727_vm1, %v1535_v2, %v1855_v56  ;;  %v1853_v60 = vmul.f32 0.2, %v1529_v46  ;;  %v1980_v48 = vsel %vm1724_vm11, %v3202_v7, %v1852_v5 }
 0x2af   :  { %2145 = vmatpush1.bf16.xpose.msra.mxu1 %v2072_v15  ;;  %vm1745_vm0 = vcmp.ge.f32.partialorder %v1579_v41, 0.0  ;;  %v1873_v27 = vmul.f32 0.2, %v1579_v41  ;;  %v1581_v57 = vadd.f32 %v1580_v58, %v2746_v44  ;;  %v3296_v15 = vsel %vm1744_vm2, %v1577_v55, %v1872_v25 }
 0x2b0   :  { %2146 = vmatprep.subr.bf16.mxu1 %v2071_v13  ;;  %v1584_v31 = vpop.f32.mrf.mxu1  ;;  %v2070_v39 = vpack.c.bf16 %v1985_v32, %v1983_v49  ;;  %vm1725_vm5 = vcmp.ge.f32.partialorder %v1529_v46, 0.0  ;;  %v2069_v2 = vpack.c.bf16 %v1982_v35, %v1980_v48  ;;  %vm1722_vm6 = vcmp.ge.f32.partialorder %v1521_v61, 0.0 }
 0x2b1   :  { %v3283_v59 = vsel %vm1745_vm0, %v1579_v41, %v1873_v27  ;;  %vm1746_vm4 = vcmp.ge.f32.partialorder %v1581_v57, 0.0  ;;  %v1874_v45 = vmul.f32 0.2, %v1581_v57  ;;  %v1585_v38 = vadd.f32 %v1584_v31, %v2663_v9 }
 0x2b2   :  { %v2078_v10 = vpack.c.bf16 %v3283_v59, %v3280_v6  ;;  %v1586_v26 = vpop.f32.mrf.mxu1  ;;  %v1850_v55 = vmul.f32 0.2, %v1521_v61  ;;  %v1851_v1 = vmul.f32 0.2, %v1525_v40  ;;  %v1848_v7 = vmul.f32 0.2, %v3198_v33 }
 0x2b3   :  { %v1587_v28 = vadd.f32 %v1586_v26, %v2746_v44  ;;  %v3298_v51 = vsel %vm1746_vm4, %v1581_v57, %v1874_v45  ;;  %v1875_v13 = vmul.f32 0.2, %v1585_v38  ;;  %vm1747_vm7 = vcmp.ge.f32.partialorder %v1585_v38, 0.0 }
 0x2b4   :  { %v1588_v30 = vpop.f32.mrf.mxu1  ;;  %v2079_v41 = vpack.c.bf16 %v3298_v51, %v3296_v15  ;;  %vm1723_vm9 = vcmp.ge.f32.partialorder %v1525_v40, 0.0  ;;  %v1981_v5 = vsel %vm1725_vm5, %v1529_v46, %v1853_v60  ;;  %v1978_v26 = vsel %vm1722_vm6, %v1521_v61, %v1850_v55 }
 0x2b5   :  { %v1589_v24 = vadd.f32 %v1588_v30, %v2663_v9  ;;  %v1876_v58 = vmul.f32 0.2, %v1587_v28  ;;  %vm1748_vm10 = vcmp.ge.f32.partialorder %v1587_v28, 0.0  ;;  %v3309_v57 = vsel %vm1747_vm7, %v1585_v38, %v1875_v13 }
 0x2b6   :  { %v1590_v56 = vpop.f32.mrf.mxu1  ;;  %v1979_v35 = vsel %vm1723_vm9, %v1525_v40, %v1851_v1  ;;  %v1976_v46 = vsel %vm1720_vm3, %v3198_v33, %v1848_v7 }
 0x2b7   :  { %2147 = vmatpush1.bf16.xpose.msra.mxu1 %v2070_v39  ;;  %vm1749_vm8 = vcmp.ge.f32.partialorder %v1589_v24, 0.0  ;;  %v1877_v25 = vmul.f32 0.2, %v1589_v24  ;;  %v1591_v27 = vadd.f32 %v1590_v56, %v2746_v44  ;;  %v3316_v49 = vsel %vm1748_vm10, %v1587_v28, %v1876_v58 }
 0x2b8   :  { %2148 = vmatprep.subr.bf16.mxu1 %v2069_v2  ;;  %v2068_v30 = vpack.c.bf16 %v1981_v5, %v1979_v35  ;;  %v1594_v48 = vpop.f32.mrf.mxu1  ;;  %v2067_v13 = vpack.c.bf16 %v1978_v26, %v1976_v46 }
 0x2b9   :  { %v3311_v32 = vsel %vm1749_vm8, %v1589_v24, %v1877_v25  ;;  %vm1750_vm11 = vcmp.ge.f32.partialorder %v1591_v27, 0.0  ;;  %v1878_v31 = vmul.f32 0.2, %v1591_v27  ;;  %v1595_v60 = vadd.f32 %v1594_v48, %v2663_v9 }
 0x2ba   :  { %v2080_v45 = vpack.c.bf16 %v3311_v32, %v3309_v57  ;;  %v3326_v24 = vpop.f32.mrf.mxu1 }
 0x2bb   :  { %v3318_v39 = vsel %vm1750_vm11, %v1591_v27, %v1878_v31  ;;  %v1879_v40 = vmul.f32 0.2, %v1595_v60  ;;  %vm1751_vm12 = vcmp.ge.f32.partialorder %v1595_v60, 0.0 }
 0x2bc   :  { %v2081_v38 = vpack.c.bf16 %v3318_v39, %v3316_v49  ;;  %v1598_v61 = vpop.f32.mrf.mxu1 }
 0x2bd   :  { %v1599_v28 = vadd.f32 %v1598_v61, %v2663_v9  ;;  %v3333_v1 = vsel %vm1751_vm12, %v1595_v60, %v1879_v40 }
 0x2be   :  { %v3329_v2 = vpop.f32.mrf.mxu1 }
 0x2bf   :  { %2149 = vmatpush1.bf16.xpose.msra.mxu1 %v2068_v30  ;;  %vm1753_vm13 = vcmp.ge.f32.partialorder %v1599_v28, 0.0  ;;  %v1881_v55 = vmul.f32 0.2, %v1599_v28 }
 0x2c0   :  { %2150 = vmatprep.subr.bf16.mxu1 %v2067_v13  ;;  %v3331_v33 = vpop.f32.mrf.mxu1 }
 0x2c1   :  { %v3335_v56 = vsel %vm1753_vm13, %v1599_v28, %v1881_v55 }
 0x2c2   :  { %v2082_v58 = vpack.c.bf16 %v3335_v56, %v3333_v1  ;;  %v3339_v25 = vpop.f32.mrf.mxu1 }
 0x2c4   :  { %v3347_v27 = vpop.f32.mrf.mxu1 }
 0x2c6   :  { %v3349_v7 = vpop.f32.mrf.mxu1 }
 0x2c7   :  { %2151 = vmatpush1.bf16.xpose.msra.mxu1 %v2066_v29 }
 0x2c8   :  { %2152 = vmatprep.subr.bf16.mxu1 %v2065_v23  ;;  %v3351_v5 = vpop.f32.mrf.mxu1 }
 0x2ca   :  { %v1616_v31 = vpop.f32.mrf.mxu1 }
 0x2cb   :  { %v1617_v55 = vadd.f32 %v1616_v31, %v2746_v44  ;;  %v1611_v31 = vadd.f32 %v3349_v7, %v2746_v44  ;;  %v1609_v7 = vadd.f32 %v3347_v27, %v2663_v9 }
 0x2cc   :  { %v1618_v22 = vpop.f32.mrf.mxu1 }
 0x2cd   :  { %vm1760_vm7 = vcmp.ge.f32.partialorder %v1617_v55, 0.0  ;;  %vm1758_vm9 = vcmp.ge.f32.partialorder %v1611_v31, 0.0  ;;  %vm1757_vm12 = vcmp.ge.f32.partialorder %v1609_v7, 0.0 }
 0x2ce   :  { %v1620_v3 = vpop.f32.mrf.mxu1 }
 0x2cf   :  { %2153 = vmatpush1.bf16.xpose.msra.mxu1 %v2064_v16  ;;  %v1621_v48 = vadd.f32 %v1620_v3, %v2746_v44  ;;  %v1888_v3 = vmul.f32 0.2, %v1617_v55 }
 0x2d0   :  { %2154 = vmatprep.subr.bf16.mxu1 %v2063_v21  ;;  %v1624_v29 = vpop.f32.mrf.mxu1 }
 0x2d1   :  { %v1625_v61 = vadd.f32 %v1624_v29, %v2663_v9  ;;  %vm1762_vm5 = vcmp.ge.f32.partialorder %v1621_v48, 0.0  ;;  %v1619_v29 = vadd.f32 %v1618_v22, %v2663_v9 }
 0x2d2   :  { %v1626_v34 = vpop.f32.mrf.mxu1 }
 0x2d3   :  { %v1627_v8 = vadd.f32 %v1626_v34, %v2746_v44  ;;  %vm1763_vm6 = vcmp.ge.f32.partialorder %v1625_v61, 0.0  ;;  %vm1761_vm8 = vcmp.ge.f32.partialorder %v1619_v29, 0.0 }
 0x2d4   :  { %v1628_v53 = vpop.f32.mrf.mxu1 }
 0x2d5   :  { %v1892_v0 = vmul.f32 0.2, %v1627_v8  ;;  %vm1764_vm3 = vcmp.ge.f32.partialorder %v1627_v8, 0.0 }
 0x2d6   :  { %v1630_v23 = vpop.f32.mrf.mxu1 }
 0x2d7   :  { %2155 = vmatpush1.bf16.xpose.msra.mxu1 %v2062_v63  ;;  %v1631_v42 = vadd.f32 %v1630_v23, %v2746_v44  ;;  %v2020_v23 = vsel %vm1764_vm3, %v1627_v8, %v1892_v0 }
 0x2d8   :  { %2156 = vmatprep.subr.bf16.mxu1 %v2061_v37  ;;  %v1634_v54 = vpop.f32.mrf.mxu1 }
 0x2d9   :  { %v1635_v4 = vadd.f32 %v1634_v54, %v2663_v9  ;;  %v1894_v12 = vmul.f32 0.2, %v1631_v42  ;;  %vm1766_vm15 = vcmp.ge.f32.partialorder %v1631_v42, 0.0 }
 0x2da   :  { %v1636_v16 = vpop.f32.mrf.mxu1 }
 0x2db   :  { %v1637_v52 = vadd.f32 %v1636_v16, %v2746_v44  ;;  %v1895_v35 = vmul.f32 0.2, %v1635_v4  ;;  %vm1767_vm1 = vcmp.ge.f32.partialorder %v1635_v4, 0.0  ;;  %v2022_v13 = vsel %vm1766_vm15, %v1631_v42, %v1894_v12 }
 0x2dc   :  { %v1638_v11 = vpop.f32.mrf.mxu1  ;;  %v2089_v16 = vpack.c.bf16 %v2022_v13, %v2020_v23 }
 0x2dd   :  { %v1639_v20 = vadd.f32 %v1638_v11, %v2663_v9  ;;  %v1896_v63 = vmul.f32 0.2, %v1637_v52  ;;  %vm1768_vm0 = vcmp.ge.f32.partialorder %v1637_v52, 0.0  ;;  %v2023_v40 = vsel %vm1767_vm1, %v1635_v4, %v1895_v35 }
 0x2de   :  { %v1640_v37 = vpop.f32.mrf.mxu1  ;;  %v1890_v11 = vmul.f32 0.2, %v1621_v48  ;;  %v1615_v4 = vadd.f32 %v3351_v5, %v2663_v9 }
 0x2df   :  { %2157 = vmatpush1.bf16.xpose.msra.mxu1 %v2060_v17  ;;  %vm1769_vm14 = vcmp.ge.f32.partialorder %v1639_v20, 0.0  ;;  %v1897_v21 = vmul.f32 0.2, %v1639_v20  ;;  %v1641_v26 = vadd.f32 %v1640_v37, %v2746_v44  ;;  %v1629_v17 = vadd.f32 %v1628_v53, %v2663_v9 }
 0x2e0   :  { %v2024_v46 = vsel %vm1768_vm0, %v1637_v52, %v1896_v63  ;;  %v1891_v53 = vmul.f32 0.2, %v1625_v61  ;;  %v2018_v52 = vsel %vm1762_vm5, %v1621_v48, %v1890_v11  ;;  %v2016_v37 = vsel %vm1760_vm7, %v1617_v55, %v1888_v3 }
 0x2e1   :  { %vm1770_vm2 = vcmp.ge.f32.partialorder %v1641_v26, 0.0  ;;  %v1898_v18 = vmul.f32 0.2, %v1641_v26  ;;  %v2025_v30 = vsel %vm1769_vm14, %v1639_v20, %v1897_v21  ;;  %v1893_v54 = vmul.f32 0.2, %v1629_v17 }
 0x2e2   :  { %v2090_v34 = vpack.c.bf16 %v2025_v30, %v2023_v40  ;;  %vm1765_vm4 = vcmp.ge.f32.partialorder %v1629_v17, 0.0  ;;  %v2019_v8 = vsel %vm1763_vm6, %v1625_v61, %v1891_v53  ;;  %v1607_v20 = vadd.f32 %v3339_v25, %v2746_v44 }
 0x2e3   :  { %v2026_v60 = vsel %vm1770_vm2, %v1641_v26, %v1898_v18  ;;  %v2021_v42 = vsel %vm1765_vm4, %v1629_v17, %v1893_v54  ;;  %v1889_v63 = vmul.f32 0.2, %v1619_v29  ;;  %v2087_v21 = vpack.c.bf16 %v2018_v52, %v2016_v37 }
 0x2e4   :  { %v2091_v28 = vpack.c.bf16 %v2026_v60, %v2024_v46  ;;  %v2088_v12 = vpack.c.bf16 %v2021_v42, %v2019_v8  ;;  %v1886_v26 = vmul.f32 0.2, %v1611_v31  ;;  %v1887_v22 = vmul.f32 0.2, %v1615_v4 }
 0x2e5   :  { %v1884_v35 = vmul.f32 0.2, %v1607_v20  ;;  %vm1759_vm10 = vcmp.ge.f32.partialorder %v1615_v4, 0.0  ;;  %vm1756_vm11 = vcmp.ge.f32.partialorder %v1607_v20, 0.0  ;;  %v2017_v5 = vsel %vm1761_vm8, %v1619_v29, %v1889_v63 }
 0x2e6   :  { %2158 = vmatprep.subr.bf16.mxu1 %v2091_v28  ;;  %v1601_v25 = vadd.f32 %v3329_v2, %v2746_v44  ;;  %v2014_v0 = vsel %vm1758_vm9, %v1611_v31, %v1886_v26  ;;  %v1605_v18 = vadd.f32 %v3331_v33, %v2663_v9  ;;  %v2015_v17 = vsel %vm1759_vm10, %v1615_v4, %v1887_v22 }
 0x2e7   :  { %2159 = vmatpush2.bf16.xpose.msra.mxu1 %v2090_v34  ;;  %v1597_v30 = vadd.f32 %v3326_v24, %v2746_v44  ;;  %v2086_v48 = vpack.c.bf16 %v2017_v5, %v2015_v17  ;;  %v2012_v46 = vsel %vm1756_vm11, %v1607_v20, %v1884_v35  ;;  %v1885_v60 = vmul.f32 0.2, %v1609_v7 }
 0x2e8   :  { %2160 = vmatprep.subr.bf16.mxu1 %v2089_v16  ;;  %v2085_v13 = vpack.c.bf16 %v2014_v0, %v2012_v46  ;;  %v1882_v61 = vmul.f32 0.2, %v1601_v25  ;;  %vm1754_vm13 = vcmp.ge.f32.partialorder %v1601_v25, 0.0  ;;  %v1883_v27 = vmul.f32 0.2, %v1605_v18 }
 0x2e9   :  { %v1880_v40 = vmul.f32 0.2, %v1597_v30  ;;  %vm1755_vm14 = vcmp.ge.f32.partialorder %v1605_v18, 0.0  ;;  %vm1752_vm15 = vcmp.ge.f32.partialorder %v1597_v30, 0.0  ;;  %v2013_v2 = vsel %vm1757_vm12, %v1609_v7, %v1885_v60 }
 0x2ea   :  { %v2010_v28 = vsel %vm1754_vm13, %v1601_v25, %v1882_v61  ;;  %v2011_v9 = vsel %vm1755_vm14, %v1605_v18, %v1883_v27  ;;  %v2093_v44 = vstv %s3436_s6 }
 0x2eb   :  { %v2084_v33 = vpack.c.bf16 %v2013_v2, %v2011_v9  ;;  %v2008_v55 = vsel %vm1752_vm15, %v1597_v30, %v1880_v40 }
 0x2ec   :  { %v2083_v34 = vpack.c.bf16 %v2010_v28, %v2008_v55 }
 0x2ef   :  { %2161 = vmatpush2.bf16.xpose.msra.mxu1 %v2088_v12 }
 0x2f0   :  { %2162 = vmatprep.subr.bf16.mxu1 %v2087_v21 }
 0x2f7   :  { %2163 = vmatpush2.bf16.xpose.msra.mxu1 %v2086_v48 }
 0x2f8   :  { %2164 = vmatprep.subr.bf16.mxu1 %v2085_v13 }
 0x2ff   :  { %2165 = vmatpush2.bf16.xpose.msra.mxu1 %v2084_v33 }
 0x300   :  { %2166 = vmatprep.subr.bf16.mxu1 %v2083_v34 }
 0x307   :  { %2167 = vmatpush2.bf16.xpose.msra.mxu1 %v2082_v58 }
 0x308   :  { %2168 = vmatprep.subr.bf16.mxu1 %v2081_v38 }
 0x30f   :  { %2169 = vmatpush2.bf16.xpose.msra.mxu1 %v2080_v45 }
 0x310   :  { %2170 = vmatprep.subr.bf16.mxu1 %v2079_v41 }
 0x317   :  { %2171 = vmatpush2.bf16.xpose.msra.mxu1 %v2078_v10 }
 0x318   :  { %2172 = vmatprep.subr.bf16.mxu1 %v2077_v47 }
 0x31f   :  { %2173 = vmatpush2.bf16.xpose.msra.mxu1 %v2076_v14 }
 0x326   :  { %2175 = vmatmul.mubr.bf16.vlgmr.msra.gmra.mxu1 %v3233_v62 }
 0x366   :  { %v2135_v15 = vpop.f32.mrf.mxu0 }
 0x367   :  { %v2136_v51 = vadd.f32 %v2135_v15, %v2093_v44 }
 0x368   :  { %v2137_v50 = vpop.f32.mrf.mxu0 }
 0x369   :  { %v2183_v41 = vmax.f32 %v2136_v51, -30.0  ;;  %v2138_v62 = vadd.f32 %v2137_v50, %v2093_v44 }
 0x36a   :  { %v2139_v19 = vpop.f32.mrf.mxu0 }
 0x36b   :  { %v2187_v57 = vsub.f32 0.0, %v2183_v41  ;;  %v2184_v14 = vmax.f32 %v2138_v62, -30.0 }
 0x36c   :  { %v2140_v36 = vpop.f32.mrf.mxu0 }
 0x36d   :  { %v2191_v6 = vmul.f32 1.442695, %v2187_v57  ;;  %v2188_v47 = vsub.f32 0.0, %v2184_v14 }
 0x36f   :  { %2349 = vpow2.f32 %v2191_v6  ;;  %v2193_v32 = vmul.f32 1.442695, %v2188_v47 }
 0x37c   :  { %v2350_v59 = vpop.eup %2349 }
 0x37d   :  { %v2199_v10 = vadd.f32 1.0, %v2350_v59 }
 0x37f   :  { %2351 = vrcp.f32 %v2199_v10 }
 0x380   :  { %2353 = vpow2.f32 %v2193_v32 }
 0x38c   :  { %v2352_v43 = vpop.eup %2351 }
 0x38d   :  { %2207 = vst [vmem:[%s3437_s7] sm:$0xff] %v2352_v43  ;;  %v2354_v45 = vpop.eup %2353 }
 0x38e   :  { %v2200_v49 = vadd.f32 1.0, %v2354_v45 }
 0x390   :  { %2355 = vrcp.f32 %v2200_v49 }
 0x39d   :  { %v2356_v39 = vpop.eup %2355 }
 0x39e   :  { %2208 = vst [vmem:[%s3437_s7 + $0x8] sm:$0xff] %v2356_v39 }
 0x3e6   :  { %v2176_v38 = vpop.f32.mrf.mxu1 }
 0x3e7   :  { %v2177_v24 = vadd.f32 %v2176_v38, %v2093_v44 }
 0x3e8   :  { %v2178_v1 = vpop.f32.mrf.mxu1 }
 0x3e9   :  { %v2185_v56 = vmax.f32 %v2177_v24, -30.0  ;;  %v2179_v58 = vadd.f32 %v2178_v1, %v2093_v44 }
 0x3ea   :  { %v2180_v23 = vpop.f32.mrf.mxu1 }
 0x3eb   :  { %v2189_v54 = vsub.f32 0.0, %v2185_v56  ;;  %v2186_v16 = vmax.f32 %v2179_v58, -30.0 }
 0x3ec   :  { %v2181_v11 = vpop.f32.mrf.mxu1 }
 0x3ed   :  { %v2195_v53 = vmul.f32 1.442695, %v2189_v54  ;;  %v2190_v3 = vsub.f32 0.0, %v2186_v16 }
 0x3ef   :  { %2357 = vpow2.f32 %v2195_v53  ;;  %v2197_v29 = vmul.f32 1.442695, %v2190_v3 }
 0x3f1   :  { %2359 = vpow2.f32 %v2197_v29 }
 0x3fc   :  { %v2358_v42 = vpop.eup %2357 }
 0x3fd   :  { %v2201_v31 = vadd.f32 1.0, %v2358_v42 }
 0x3fe   :  { %v2360_v52 = vpop.eup %2359 }
 0x3ff   :  { %2361 = vrcp.f32 %v2201_v31  ;;  %v2202_v4 = vadd.f32 1.0, %v2360_v52 }
 0x401   :  { %2363 = vrcp.f32 %v2202_v4 }
 0x40c   :  { %v2362_v8 = vpop.eup %2361 }
 0x40d   :  { %2209 = vst [vmem:[%s3437_s7 + $0x10] sm:$0xff] %v2362_v8 }
 0x40e   :  { %v2364_v20 = vpop.eup %2363 }
 0x40f   :  { %2210 = vst [vmem:[%s3437_s7 + $0x18] sm:$0xff] %v2364_v20 }
 0x410   :  { %2215 = vsyncpa [#allocation4], 1 }
 0x411   :  { %2216 = vsyncpa [#allocation6], 1 }
 0x412   :  { %2217 = vsyncpa [#allocation9], 1 }

</bundles_post_ra>
